<compile_context>
chip_gen: v5e
topology: v5e:2x2
jax: 0.10.0
libtpu: 0.0.40
codegen_flags: <defaults>
</compile_context>

<pallas_src>
import functools

import jax
import jax.numpy as jnp
from jax.experimental import pallas as pl
from jax.experimental.pallas import tpu as pltpu


# ----------------------------------------------------------------------------
# Fused kernel: L LSTM layers + fc, everything resident in VMEM.
# Kernel gate order is (i, f, o, g) (permuted wrapper-side from PyTorch (i, f, g, o)).
# ----------------------------------------------------------------------------
def _char_rnn_fused_kernel(*refs, n_layers, hidden, seq_len, batch):
    H, T, B, L = hidden, seq_len, batch, n_layers

    # ---- unpack refs: inputs..., outputs..., scratch... ----
    idx = 0
    x_ref = refs[idx]; idx += 1                       # (T*B, V) flat time-major
    layer_w = []
    for _ in range(L):
        layer_w.append((refs[idx], refs[idx + 1], refs[idx + 2]))  # wih_t, whh_t, b
        idx += 3
    wfc_ref, bfc_ref, h0_ref, c0_ref = refs[idx:idx + 4]; idx += 4
    out_ref, hn_ref, cn_ref = refs[idx:idx + 3]; idx += 3
    xp_s, y_s = refs[idx:idx + 2]                     # (T*B, 4H), (T*B, H) f32 scratch

    for l in range(L):                                # static layer loop
        wih_ref, whh_ref, b_ref = layer_w[l]
        wih = wih_ref[...]                            # (in, 4H)   matmul dtype
        whh = whh_ref[...]                            # (H, 4H)    matmul dtype
        bias = b_ref[...]                             # (1, 4H)    f32

        # ---- Hoisted input projection: ONE matmul over all T*B rows, off the
        # recurrent path; bias broadcast happens exactly once per layer. ----
        inp = x_ref[...] if l == 0 else y_s[...]
        xp_s[...] = (jnp.dot(inp.astype(wih.dtype), wih,
                             preferred_element_type=jnp.float32) + bias)

        def lstm_step(t, h, c):
            if isinstance(t, int):
                row = t * B                           # static index (unrolled path)
            else:
                row = pl.multiple_of(t * B, B)        # dynamic, aligned hint
            # Only the recurrent matmul remains on the serial critical path.
            gates = (xp_s[pl.ds(row, B), :]
                     + jnp.dot(h.astype(whh.dtype), whh,
                               preferred_element_type=jnp.float32))   # (B, 4H) f32
            # Gate order (i, f, o, g): sigmoid on first 3H lanes, tanh on last H only.
            sig = jax.nn.sigmoid(gates[:, 0:3 * H])
            g_g = jnp.tanh(gates[:, 3 * H:4 * H])
            i_g = sig[:, 0 * H:1 * H]
            f_g = sig[:, 1 * H:2 * H]
            o_g = sig[:, 2 * H:3 * H]
            c_new = f_g * c + i_g * g_g
            h_new = o_g * jnp.tanh(c_new)
            y_s[pl.ds(row, B), :] = h_new             # contiguous time-major rows
            return h_new, c_new

        h_cur = h0_ref[l]                             # (B, H)
        c_cur = c0_ref[l]
        if T <= 16:
            # Short static trip count: fully unroll at trace time.
            for t in range(T):
                h_cur, c_cur = lstm_step(t, h_cur, c_cur)
        else:
            # Bounded register pressure + scheduler visibility for long sequences.
            h_cur, c_cur = jax.lax.fori_loop(
                0, T, lambda t, hc: lstm_step(t, hc[0], hc[1]), (h_cur, c_cur),
                unroll=4)

        hn_ref[l] = h_cur
        cn_ref[l] = c_cur

    # ---- fc: one matmul + one store over all T*B rows (time-major). ----
    wfc = wfc_ref[...]                                # (H, V)
    out_ref[...] = (jnp.dot(y_s[...].astype(wfc.dtype), wfc,
                            preferred_element_type=jnp.float32) + bfc_ref[...])


# ----------------------------------------------------------------------------
# CharRNN module equivalent (parameters initialized deterministically).
# ----------------------------------------------------------------------------
class CharRNNPallas:
    def __init__(self, tokens, n_hidden=256, n_layers=2, drop_prob=0.5, lr=0.001,
                 seed=0, matmul_dtype=jnp.float32):
        self.chars = tokens
        self.int2char = dict(enumerate(self.chars))
        self.char2int = {ch: ii for ii, ch in self.int2char.items()}
        self.n_hidden = n_hidden
        self.n_layers = n_layers
        self.drop_prob = drop_prob
        self.lr = lr
        self.matmul_dtype = matmul_dtype
        V = len(tokens)
        H = n_hidden

        key = jax.random.PRNGKey(seed)
        scale = 1.0 / jnp.sqrt(jnp.float32(H))

        # Column permutation: PyTorch gate order (i, f, g, o) -> kernel order (i, f, o, g).
        perm = jnp.concatenate([jnp.arange(0, H), jnp.arange(H, 2 * H),
                                jnp.arange(3 * H, 4 * H), jnp.arange(2 * H, 3 * H)])

        self.layers = []
        in_sz = V
        for _ in range(n_layers):
            key, k1, k2, k3, k4 = jax.random.split(key, 5)
            w_ih = jax.random.uniform(k1, (4 * H, in_sz), jnp.float32, -scale, scale)
            w_hh = jax.random.uniform(k2, (4 * H, H), jnp.float32, -scale, scale)
            b_ih = jax.random.uniform(k3, (4 * H,), jnp.float32, -scale, scale)
            b_hh = jax.random.uniform(k4, (4 * H,), jnp.float32, -scale, scale)
            wih_t = jnp.transpose(w_ih)                        # (in_sz, 4H) PyTorch order
            whh_t = jnp.transpose(w_hh)                        # (H, 4H)     PyTorch order
            b = (b_ih + b_hh).reshape(1, 4 * H)                # (1, 4H)     PyTorch order
            self.layers.append(dict(
                # Kernel copies: gate-permuted once host-side; MXU operands in matmul_dtype.
                wih_t=wih_t[:, perm].astype(matmul_dtype),
                whh_t=whh_t[:, perm].astype(matmul_dtype),
                b=b[:, perm],                                  # bias added post-dot in f32
                # Reference copies (original PyTorch order, f32).
                wih_t_pt=wih_t, whh_t_pt=whh_t, b_pt=b,
            ))
            in_sz = H

        key, kf1, kf2 = jax.random.split(key, 3)
        fc_scale = 1.0 / jnp.sqrt(jnp.float32(H))
        w_fc = jax.random.uniform(kf1, (V, H), jnp.float32, -fc_scale, fc_scale)
        b_fc = jax.random.uniform(kf2, (V,), jnp.float32, -fc_scale, fc_scale)
        self.fc_w_t_pt = jnp.transpose(w_fc)                   # (H, V) f32 (reference)
        self.fc_w_t = self.fc_w_t_pt.astype(matmul_dtype)      # (H, V) kernel copy
        self.fc_b = b_fc.reshape(1, V)                         # (1, V) f32

    def init_hidden(self, batch_size):
        z = jnp.zeros((self.n_layers, batch_size, self.n_hidden), jnp.float32)
        return (z, z)

    def forward(self, x, hidden):
        """x: (B, T, V) batch_first; hidden: (h0, c0) each (L, B, H)."""
        h0, c0 = hidden
        B, T, V = x.shape
        H, L = self.n_hidden, self.n_layers

        # Wrapper glue: flat time-major input (row = t*B + b) -- one tiny XLA transpose.
        x_tm = jnp.transpose(x, (1, 0, 2)).reshape(T * B, V)

        weight_args = []
        for p in self.layers:
            weight_args += [p["wih_t"], p["whh_t"], p["b"]]

        kernel = functools.partial(
            _char_rnn_fused_kernel,
            n_layers=L, hidden=H, seq_len=T, batch=B)

        out_tm, h_n, c_n = pl.pallas_call(
            kernel,
            out_shape=(jax.ShapeDtypeStruct((T * B, V), jnp.float32),   # fc out, time-major
                       jax.ShapeDtypeStruct((L, B, H), jnp.float32),    # h_n
                       jax.ShapeDtypeStruct((L, B, H), jnp.float32)),   # c_n
            scratch_shapes=[pltpu.VMEM((T * B, 4 * H), jnp.float32),    # hoisted x-proj
                            pltpu.VMEM((T * B, H), jnp.float32)],       # layer outputs
        )(x_tm, *weight_args, self.fc_w_t, self.fc_b, h0, c0)

        # Time-major rows (t*B + b) -> PyTorch batch-first flattening (b*T + t).
        out = jnp.transpose(out_tm.reshape(T, B, V), (1, 0, 2)).reshape(B * T, V)
        # TODO(synk): training-mode dropout (inter-layer + self.dropout) not implemented;
        #             eval-mode identity semantics are used.
        return out, (h_n, c_n)


# ----------------------------------------------------------------------------
# Pure-JAX reference (PyTorch gate order, f32) for a self-contained correctness check.
# ----------------------------------------------------------------------------
def _reference_forward(model, x, hidden):
    h0, c0 = hidden
    B, T, V = x.shape
    H = model.n_hidden
    layer_in = x
    hns, cns = [], []
    for l, p in enumerate(model.layers):
        wih_t, whh_t, b = p["wih_t_pt"], p["whh_t_pt"], p["b_pt"]
        h, c = h0[l], c0[l]
        ys = []
        for t in range(T):
            gates = layer_in[:, t, :] @ wih_t + h @ whh_t + b
            i = jax.nn.sigmoid(gates[:, 0 * H:1 * H])
            f = jax.nn.sigmoid(gates[:, 1 * H:2 * H])
            g = jnp.tanh(gates[:, 2 * H:3 * H])
            o = jax.nn.sigmoid(gates[:, 3 * H:4 * H])
            c = f * c + i * g
            h = o * jnp.tanh(c)
            ys.append(h)
        layer_in = jnp.stack(ys, axis=1)              # (B, T, H)
        hns.append(h)
        cns.append(c)
    out = layer_in.reshape(B * T, H) @ model.fc_w_t_pt + model.fc_b
    return out, (jnp.stack(hns, axis=0), jnp.stack(cns, axis=0))


if __name__ == "__main__":
    tokens = [chr(ord('a') + i) for i in range(16)]         # vocab = 16
    batch, seq, n_hidden, n_layers = 2, 8, 32, 2
    vocab = len(tokens)

    x = jax.random.normal(jax.random.PRNGKey(0), (batch, seq, vocab), jnp.float32)

    # ---- f32 matmul operands: tight check against the pure-JAX reference. ----
    model = CharRNNPallas(tokens, n_hidden=n_hidden, n_layers=n_layers, seed=0)
    hidden = model.init_hidden(batch)
    out, (h_n, c_n) = model.forward(x, hidden)
    jax.block_until_ready((out, h_n, c_n))

    assert out.shape == (batch * seq, vocab)
    assert h_n.shape == (n_layers, batch, n_hidden)
    assert c_n.shape == (n_layers, batch, n_hidden)

    out_ref, (h_ref, c_ref) = _reference_forward(model, x, hidden)
    assert jnp.allclose(out, out_ref, atol=2e-3, rtol=2e-3)
    assert jnp.allclose(h_n, h_ref, atol=2e-3, rtol=2e-3)
    assert jnp.allclose(c_n, c_ref, atol=2e-3, rtol=2e-3)

    # ---- bf16 MXU operands (v6e/v7x lever); elementwise math stays f32. Loose check. ----
    model_bf16 = CharRNNPallas(tokens, n_hidden=n_hidden, n_layers=n_layers, seed=0,
                               matmul_dtype=jnp.bfloat16)
    out_b, (h_b, c_b) = model_bf16.forward(x, model_bf16.init_hidden(batch))
    jax.block_until_ready((out_b, h_b, c_b))
    assert jnp.allclose(out_b, out_ref, atol=0.15, rtol=0.15)

    print("KERNEL_OK")
</pallas_src>

<mosaic_0001>
module attributes {stable_mosaic.version = 11 : i64} {
  func.func @_char_rnn_fused_kernel(%arg0: memref<16x16xf32, #tpu.memory_space<vmem>>, %arg1: memref<16x128xf32, #tpu.memory_space<vmem>>, %arg2: memref<32x128xf32, #tpu.memory_space<vmem>>, %arg3: memref<1x128xf32, #tpu.memory_space<vmem>>, %arg4: memref<32x128xf32, #tpu.memory_space<vmem>>, %arg5: memref<32x128xf32, #tpu.memory_space<vmem>>, %arg6: memref<1x128xf32, #tpu.memory_space<vmem>>, %arg7: memref<32x16xf32, #tpu.memory_space<vmem>>, %arg8: memref<1x16xf32, #tpu.memory_space<vmem>>, %arg9: memref<2x2x32xf32, #tpu.memory_space<vmem>>, %arg10: memref<2x2x32xf32, #tpu.memory_space<vmem>>, %arg11: memref<16x16xf32, #tpu.memory_space<vmem>>, %arg12: memref<2x2x32xf32, #tpu.memory_space<vmem>>, %arg13: memref<2x2x32xf32, #tpu.memory_space<vmem>>, %arg14: memref<16x128xf32, #tpu.memory_space<vmem>>, %arg15: memref<16x32xf32, #tpu.memory_space<vmem>>) attributes {dimension_semantics = [], scalar_prefetch = 0 : i64, scratch_operands = 2 : i64, tpu.core_type = #tpu.core_type<tc>} {
    %c0 = arith.constant 0 : index
    %c0_0 = arith.constant 0 : index
    %0 = vector.load %arg1[%c0, %c0_0] : memref<16x128xf32, #tpu.memory_space<vmem>>, vector<16x128xf32>
    %c0_1 = arith.constant 0 : index
    %c0_2 = arith.constant 0 : index
    %1 = vector.load %arg2[%c0_1, %c0_2] : memref<32x128xf32, #tpu.memory_space<vmem>>, vector<32x128xf32>
    %c0_3 = arith.constant 0 : index
    %c0_4 = arith.constant 0 : index
    %2 = vector.load %arg3[%c0_3, %c0_4] : memref<1x128xf32, #tpu.memory_space<vmem>>, vector<1x128xf32>
    %c0_5 = arith.constant 0 : index
    %c0_6 = arith.constant 0 : index
    %3 = vector.load %arg0[%c0_5, %c0_6] : memref<16x16xf32, #tpu.memory_space<vmem>>, vector<16x16xf32>
    %cst = arith.constant dense<0.000000e+00> : vector<16x128xf32>
    %4 = tpu.matmul %3, %0, %cst {dimension_numbers = #tpu.dot_dimension_numbers<[1], [0], [0], [1], [0, 0, 1, 1], [], []>} : vector<16x16xf32>, vector<16x128xf32>, vector<16x128xf32> -> vector<16x128xf32>
    %5 = vector.broadcast %2 : vector<1x128xf32> to vector<16x128xf32>
    %6 = arith.addf %4, %5 : vector<16x128xf32>
    %c0_7 = arith.constant 0 : index
    %c0_8 = arith.constant 0 : index
    %7 = vector.load %arg14[%c0_7, %c0_8] : memref<16x128xf32, #tpu.memory_space<vmem>>, vector<16x128xf32>
    tpu.vector_store %arg14[%c0_7, %c0_8], %6 {strides = array<i32>} : memref<16x128xf32, #tpu.memory_space<vmem>>, vector<16x128xf32>,
    %c0_9 = arith.constant 0 : index
    %c0_10 = arith.constant 0 : index
    %c0_11 = arith.constant 0 : index
    %8 = vector.load %arg9[%c0_9, %c0_10, %c0_11] : memref<2x2x32xf32, #tpu.memory_space<vmem>>, vector<1x2x32xf32>
    %9 = vector.shape_cast %8 : vector<1x2x32xf32> to vector<2x32xf32>
    %c0_12 = arith.constant 0 : index
    %c0_13 = arith.constant 0 : index
    %c0_14 = arith.constant 0 : index
    %10 = vector.load %arg10[%c0_12, %c0_13, %c0_14] : memref<2x2x32xf32, #tpu.memory_space<vmem>>, vector<1x2x32xf32>
    %11 = vector.shape_cast %10 : vector<1x2x32xf32> to vector<2x32xf32>
    %c0_15 = arith.constant 0 : index
    %c0_16 = arith.constant 0 : index
    %12 = vector.load %arg14[%c0_15, %c0_16] : memref<16x128xf32, #tpu.memory_space<vmem>>, vector<2x128xf32>
    %cst_17 = arith.constant dense<0.000000e+00> : vector<2x128xf32>
    %13 = tpu.matmul %9, %1, %cst_17 {dimension_numbers = #tpu.dot_dimension_numbers<[1], [0], [0], [1], [0, 0, 1, 1], [], []>} : vector<2x32xf32>, vector<32x128xf32>, vector<2x128xf32> -> vector<2x128xf32>
    %14 = arith.addf %12, %13 : vector<2x128xf32>
    %15 = vector.extract_strided_slice %14 {offsets = [0, 0], sizes = [2, 96], strides = [1, 1]} : vector<2x128xf32> to vector<2x96xf32>
    %16 = arith.negf %15 : vector<2x96xf32>
    %17 = math.exp %16 : vector<2x96xf32>
    %cst_18 = arith.constant 1.000000e+00 : f32
    %18 = vector.broadcast %cst_18 : f32 to vector<2x96xf32>
    %19 = arith.addf %18, %17 : vector<2x96xf32>
    %20 = arith.divf %18, %19 : vector<2x96xf32>
    %21 = vector.extract_strided_slice %14 {offsets = [0, 96], sizes = [2, 32], strides = [1, 1]} : vector<2x128xf32> to vector<2x32xf32>
    %22 = math.tanh %21 : vector<2x32xf32>
    %23 = vector.extract_strided_slice %20 {offsets = [0, 0], sizes = [2, 32], strides = [1, 1]} : vector<2x96xf32> to vector<2x32xf32>
    %24 = vector.extract_strided_slice %20 {offsets = [0, 32], sizes = [2, 32], strides = [1, 1]} : vector<2x96xf32> to vector<2x32xf32>
    %25 = vector.extract_strided_slice %20 {offsets = [0, 64], sizes = [2, 32], strides = [1, 1]} : vector<2x96xf32> to vector<2x32xf32>
    %26 = arith.mulf %24, %11 : vector<2x32xf32>
    %27 = arith.mulf %23, %22 : vector<2x32xf32>
    %28 = arith.addf %26, %27 : vector<2x32xf32>
    %29 = math.tanh %28 : vector<2x32xf32>
    %30 = arith.mulf %25, %29 : vector<2x32xf32>
    %c0_19 = arith.constant 0 : index
    %c0_20 = arith.constant 0 : index
    %31 = vector.load %arg15[%c0_19, %c0_20] : memref<16x32xf32, #tpu.memory_space<vmem>>, vector<2x32xf32>
    tpu.vector_store %arg15[%c0_19, %c0_20], %30 {strides = array<i32>} : memref<16x32xf32, #tpu.memory_space<vmem>>, vector<2x32xf32>,
    %c2 = arith.constant 2 : index
    %c0_21 = arith.constant 0 : index
    %32 = vector.load %arg14[%c2, %c0_21] : memref<16x128xf32, #tpu.memory_space<vmem>>, vector<2x128xf32>
    %cst_22 = arith.constant dense<0.000000e+00> : vector<2x128xf32>
    %33 = tpu.matmul %30, %1, %cst_22 {dimension_numbers = #tpu.dot_dimension_numbers<[1], [0], [0], [1], [0, 0, 1, 1], [], []>} : vector<2x32xf32>, vector<32x128xf32>, vector<2x128xf32> -> vector<2x128xf32>
    %34 = arith.addf %32, %33 : vector<2x128xf32>
    %35 = vector.extract_strided_slice %34 {offsets = [0, 0], sizes = [2, 96], strides = [1, 1]} : vector<2x128xf32> to vector<2x96xf32>
    %36 = arith.negf %35 : vector<2x96xf32>
    %37 = math.exp %36 : vector<2x96xf32>
    %cst_23 = arith.constant 1.000000e+00 : f32
    %38 = vector.broadcast %cst_23 : f32 to vector<2x96xf32>
    %39 = arith.addf %38, %37 : vector<2x96xf32>
    %40 = arith.divf %38, %39 : vector<2x96xf32>
    %41 = vector.extract_strided_slice %34 {offsets = [0, 96], sizes = [2, 32], strides = [1, 1]} : vector<2x128xf32> to vector<2x32xf32>
    %42 = math.tanh %41 : vector<2x32xf32>
    %43 = vector.extract_strided_slice %40 {offsets = [0, 0], sizes = [2, 32], strides = [1, 1]} : vector<2x96xf32> to vector<2x32xf32>
    %44 = vector.extract_strided_slice %40 {offsets = [0, 32], sizes = [2, 32], strides = [1, 1]} : vector<2x96xf32> to vector<2x32xf32>
    %45 = vector.extract_strided_slice %40 {offsets = [0, 64], sizes = [2, 32], strides = [1, 1]} : vector<2x96xf32> to vector<2x32xf32>
    %46 = arith.mulf %44, %28 : vector<2x32xf32>
    %47 = arith.mulf %43, %42 : vector<2x32xf32>
    %48 = arith.addf %46, %47 : vector<2x32xf32>
    %49 = math.tanh %48 : vector<2x32xf32>
    %50 = arith.mulf %45, %49 : vector<2x32xf32>
    %c2_24 = arith.constant 2 : index
    %c0_25 = arith.constant 0 : index
    %51 = vector.load %arg15[%c2_24, %c0_25] : memref<16x32xf32, #tpu.memory_space<vmem>>, vector<2x32xf32>
    tpu.vector_store %arg15[%c2_24, %c0_25], %50 {strides = array<i32>} : memref<16x32xf32, #tpu.memory_space<vmem>>, vector<2x32xf32>,
    %c4 = arith.constant 4 : index
    %c0_26 = arith.constant 0 : index
    %52 = vector.load %arg14[%c4, %c0_26] : memref<16x128xf32, #tpu.memory_space<vmem>>, vector<2x128xf32>
    %cst_27 = arith.constant dense<0.000000e+00> : vector<2x128xf32>
    %53 = tpu.matmul %50, %1, %cst_27 {dimension_numbers = #tpu.dot_dimension_numbers<[1], [0], [0], [1], [0, 0, 1, 1], [], []>} : vector<2x32xf32>, vector<32x128xf32>, vector<2x128xf32> -> vector<2x128xf32>
    %54 = arith.addf %52, %53 : vector<2x128xf32>
    %55 = vector.extract_strided_slice %54 {offsets = [0, 0], sizes = [2, 96], strides = [1, 1]} : vector<2x128xf32> to vector<2x96xf32>
    %56 = arith.negf %55 : vector<2x96xf32>
    %57 = math.exp %56 : vector<2x96xf32>
    %cst_28 = arith.constant 1.000000e+00 : f32
    %58 = vector.broadcast %cst_28 : f32 to vector<2x96xf32>
    %59 = arith.addf %58, %57 : vector<2x96xf32>
    %60 = arith.divf %58, %59 : vector<2x96xf32>
    %61 = vector.extract_strided_slice %54 {offsets = [0, 96], sizes = [2, 32], strides = [1, 1]} : vector<2x128xf32> to vector<2x32xf32>
    %62 = math.tanh %61 : vector<2x32xf32>
    %63 = vector.extract_strided_slice %60 {offsets = [0, 0], sizes = [2, 32], strides = [1, 1]} : vector<2x96xf32> to vector<2x32xf32>
    %64 = vector.extract_strided_slice %60 {offsets = [0, 32], sizes = [2, 32], strides = [1, 1]} : vector<2x96xf32> to vector<2x32xf32>
    %65 = vector.extract_strided_slice %60 {offsets = [0, 64], sizes = [2, 32], strides = [1, 1]} : vector<2x96xf32> to vector<2x32xf32>
    %66 = arith.mulf %64, %48 : vector<2x32xf32>
    %67 = arith.mulf %63, %62 : vector<2x32xf32>
    %68 = arith.addf %66, %67 : vector<2x32xf32>
    %69 = math.tanh %68 : vector<2x32xf32>
    %70 = arith.mulf %65, %69 : vector<2x32xf32>
    %c4_29 = arith.constant 4 : index
    %c0_30 = arith.constant 0 : index
    %71 = vector.load %arg15[%c4_29, %c0_30] : memref<16x32xf32, #tpu.memory_space<vmem>>, vector<2x32xf32>
    tpu.vector_store %arg15[%c4_29, %c0_30], %70 {strides = array<i32>} : memref<16x32xf32, #tpu.memory_space<vmem>>, vector<2x32xf32>,
    %c6 = arith.constant 6 : index
    %c0_31 = arith.constant 0 : index
    %72 = vector.load %arg14[%c6, %c0_31] : memref<16x128xf32, #tpu.memory_space<vmem>>, vector<2x128xf32>
    %cst_32 = arith.constant dense<0.000000e+00> : vector<2x128xf32>
    %73 = tpu.matmul %70, %1, %cst_32 {dimension_numbers = #tpu.dot_dimension_numbers<[1], [0], [0], [1], [0, 0, 1, 1], [], []>} : vector<2x32xf32>, vector<32x128xf32>, vector<2x128xf32> -> vector<2x128xf32>
    %74 = arith.addf %72, %73 : vector<2x128xf32>
    %75 = vector.extract_strided_slice %74 {offsets = [0, 0], sizes = [2, 96], strides = [1, 1]} : vector<2x128xf32> to vector<2x96xf32>
    %76 = arith.negf %75 : vector<2x96xf32>
    %77 = math.exp %76 : vector<2x96xf32>
    %cst_33 = arith.constant 1.000000e+00 : f32
    %78 = vector.broadcast %cst_33 : f32 to vector<2x96xf32>
    %79 = arith.addf %78, %77 : vector<2x96xf32>
    %80 = arith.divf %78, %79 : vector<2x96xf32>
    %81 = vector.extract_strided_slice %74 {offsets = [0, 96], sizes = [2, 32], strides = [1, 1]} : vector<2x128xf32> to vector<2x32xf32>
    %82 = math.tanh %81 : vector<2x32xf32>
    %83 = vector.extract_strided_slice %80 {offsets = [0, 0], sizes = [2, 32], strides = [1, 1]} : vector<2x96xf32> to vector<2x32xf32>
    %84 = vector.extract_strided_slice %80 {offsets = [0, 32], sizes = [2, 32], strides = [1, 1]} : vector<2x96xf32> to vector<2x32xf32>
    %85 = vector.extract_strided_slice %80 {offsets = [0, 64], sizes = [2, 32], strides = [1, 1]} : vector<2x96xf32> to vector<2x32xf32>
    %86 = arith.mulf %84, %68 : vector<2x32xf32>
    %87 = arith.mulf %83, %82 : vector<2x32xf32>
    %88 = arith.addf %86, %87 : vector<2x32xf32>
    %89 = math.tanh %88 : vector<2x32xf32>
    %90 = arith.mulf %85, %89 : vector<2x32xf32>
    %c6_34 = arith.constant 6 : index
    %c0_35 = arith.constant 0 : index
    %91 = vector.load %arg15[%c6_34, %c0_35] : memref<16x32xf32, #tpu.memory_space<vmem>>, vector<2x32xf32>
    tpu.vector_store %arg15[%c6_34, %c0_35], %90 {strides = array<i32>} : memref<16x32xf32, #tpu.memory_space<vmem>>, vector<2x32xf32>,
    %c8 = arith.constant 8 : index
    %c0_36 = arith.constant 0 : index
    %92 = vector.load %arg14[%c8, %c0_36] : memref<16x128xf32, #tpu.memory_space<vmem>>, vector<2x128xf32>
    %cst_37 = arith.constant dense<0.000000e+00> : vector<2x128xf32>
    %93 = tpu.matmul %90, %1, %cst_37 {dimension_numbers = #tpu.dot_dimension_numbers<[1], [0], [0], [1], [0, 0, 1, 1], [], []>} : vector<2x32xf32>, vector<32x128xf32>, vector<2x128xf32> -> vector<2x128xf32>
    %94 = arith.addf %92, %93 : vector<2x128xf32>
    %95 = vector.extract_strided_slice %94 {offsets = [0, 0], sizes = [2, 96], strides = [1, 1]} : vector<2x128xf32> to vector<2x96xf32>
    %96 = arith.negf %95 : vector<2x96xf32>
    %97 = math.exp %96 : vector<2x96xf32>
    %cst_38 = arith.constant 1.000000e+00 : f32
    %98 = vector.broadcast %cst_38 : f32 to vector<2x96xf32>
    %99 = arith.addf %98, %97 : vector<2x96xf32>
    %100 = arith.divf %98, %99 : vector<2x96xf32>
    %101 = vector.extract_strided_slice %94 {offsets = [0, 96], sizes = [2, 32], strides = [1, 1]} : vector<2x128xf32> to vector<2x32xf32>
    %102 = math.tanh %101 : vector<2x32xf32>
    %103 = vector.extract_strided_slice %100 {offsets = [0, 0], sizes = [2, 32], strides = [1, 1]} : vector<2x96xf32> to vector<2x32xf32>
    %104 = vector.extract_strided_slice %100 {offsets = [0, 32], sizes = [2, 32], strides = [1, 1]} : vector<2x96xf32> to vector<2x32xf32>
    %105 = vector.extract_strided_slice %100 {offsets = [0, 64], sizes = [2, 32], strides = [1, 1]} : vector<2x96xf32> to vector<2x32xf32>
    %106 = arith.mulf %104, %88 : vector<2x32xf32>
    %107 = arith.mulf %103, %102 : vector<2x32xf32>
    %108 = arith.addf %106, %107 : vector<2x32xf32>
    %109 = math.tanh %108 : vector<2x32xf32>
    %110 = arith.mulf %105, %109 : vector<2x32xf32>
    %c8_39 = arith.constant 8 : index
    %c0_40 = arith.constant 0 : index
    %111 = vector.load %arg15[%c8_39, %c0_40] : memref<16x32xf32, #tpu.memory_space<vmem>>, vector<2x32xf32>
    tpu.vector_store %arg15[%c8_39, %c0_40], %110 {strides = array<i32>} : memref<16x32xf32, #tpu.memory_space<vmem>>, vector<2x32xf32>,
    %c10 = arith.constant 10 : index
    %c0_41 = arith.constant 0 : index
    %112 = vector.load %arg14[%c10, %c0_41] : memref<16x128xf32, #tpu.memory_space<vmem>>, vector<2x128xf32>
    %cst_42 = arith.constant dense<0.000000e+00> : vector<2x128xf32>
    %113 = tpu.matmul %110, %1, %cst_42 {dimension_numbers = #tpu.dot_dimension_numbers<[1], [0], [0], [1], [0, 0, 1, 1], [], []>} : vector<2x32xf32>, vector<32x128xf32>, vector<2x128xf32> -> vector<2x128xf32>
    %114 = arith.addf %112, %113 : vector<2x128xf32>
    %115 = vector.extract_strided_slice %114 {offsets = [0, 0], sizes = [2, 96], strides = [1, 1]} : vector<2x128xf32> to vector<2x96xf32>
    %116 = arith.negf %115 : vector<2x96xf32>
    %117 = math.exp %116 : vector<2x96xf32>
    %cst_43 = arith.constant 1.000000e+00 : f32
    %118 = vector.broadcast %cst_43 : f32 to vector<2x96xf32>
    %119 = arith.addf %118, %117 : vector<2x96xf32>
    %120 = arith.divf %118, %119 : vector<2x96xf32>
    %121 = vector.extract_strided_slice %114 {offsets = [0, 96], sizes = [2, 32], strides = [1, 1]} : vector<2x128xf32> to vector<2x32xf32>
    %122 = math.tanh %121 : vector<2x32xf32>
    %123 = vector.extract_strided_slice %120 {offsets = [0, 0], sizes = [2, 32], strides = [1, 1]} : vector<2x96xf32> to vector<2x32xf32>
    %124 = vector.extract_strided_slice %120 {offsets = [0, 32], sizes = [2, 32], strides = [1, 1]} : vector<2x96xf32> to vector<2x32xf32>
    %125 = vector.extract_strided_slice %120 {offsets = [0, 64], sizes = [2, 32], strides = [1, 1]} : vector<2x96xf32> to vector<2x32xf32>
    %126 = arith.mulf %124, %108 : vector<2x32xf32>
    %127 = arith.mulf %123, %122 : vector<2x32xf32>
    %128 = arith.addf %126, %127 : vector<2x32xf32>
    %129 = math.tanh %128 : vector<2x32xf32>
    %130 = arith.mulf %125, %129 : vector<2x32xf32>
    %c10_44 = arith.constant 10 : index
    %c0_45 = arith.constant 0 : index
    %131 = vector.load %arg15[%c10_44, %c0_45] : memref<16x32xf32, #tpu.memory_space<vmem>>, vector<2x32xf32>
    tpu.vector_store %arg15[%c10_44, %c0_45], %130 {strides = array<i32>} : memref<16x32xf32, #tpu.memory_space<vmem>>, vector<2x32xf32>,
    %c12 = arith.constant 12 : index
    %c0_46 = arith.constant 0 : index
    %132 = vector.load %arg14[%c12, %c0_46] : memref<16x128xf32, #tpu.memory_space<vmem>>, vector<2x128xf32>
    %cst_47 = arith.constant dense<0.000000e+00> : vector<2x128xf32>
    %133 = tpu.matmul %130, %1, %cst_47 {dimension_numbers = #tpu.dot_dimension_numbers<[1], [0], [0], [1], [0, 0, 1, 1], [], []>} : vector<2x32xf32>, vector<32x128xf32>, vector<2x128xf32> -> vector<2x128xf32>
    %134 = arith.addf %132, %133 : vector<2x128xf32>
    %135 = vector.extract_strided_slice %134 {offsets = [0, 0], sizes = [2, 96], strides = [1, 1]} : vector<2x128xf32> to vector<2x96xf32>
    %136 = arith.negf %135 : vector<2x96xf32>
    %137 = math.exp %136 : vector<2x96xf32>
    %cst_48 = arith.constant 1.000000e+00 : f32
    %138 = vector.broadcast %cst_48 : f32 to vector<2x96xf32>
    %139 = arith.addf %138, %137 : vector<2x96xf32>
    %140 = arith.divf %138, %139 : vector<2x96xf32>
    %141 = vector.extract_strided_slice %134 {offsets = [0, 96], sizes = [2, 32], strides = [1, 1]} : vector<2x128xf32> to vector<2x32xf32>
    %142 = math.tanh %141 : vector<2x32xf32>
    %143 = vector.extract_strided_slice %140 {offsets = [0, 0], sizes = [2, 32], strides = [1, 1]} : vector<2x96xf32> to vector<2x32xf32>
    %144 = vector.extract_strided_slice %140 {offsets = [0, 32], sizes = [2, 32], strides = [1, 1]} : vector<2x96xf32> to vector<2x32xf32>
    %145 = vector.extract_strided_slice %140 {offsets = [0, 64], sizes = [2, 32], strides = [1, 1]} : vector<2x96xf32> to vector<2x32xf32>
    %146 = arith.mulf %144, %128 : vector<2x32xf32>
    %147 = arith.mulf %143, %142 : vector<2x32xf32>
    %148 = arith.addf %146, %147 : vector<2x32xf32>
    %149 = math.tanh %148 : vector<2x32xf32>
    %150 = arith.mulf %145, %149 : vector<2x32xf32>
    %c12_49 = arith.constant 12 : index
    %c0_50 = arith.constant 0 : index
    %151 = vector.load %arg15[%c12_49, %c0_50] : memref<16x32xf32, #tpu.memory_space<vmem>>, vector<2x32xf32>
    tpu.vector_store %arg15[%c12_49, %c0_50], %150 {strides = array<i32>} : memref<16x32xf32, #tpu.memory_space<vmem>>, vector<2x32xf32>,
    %c14 = arith.constant 14 : index
    %c0_51 = arith.constant 0 : index
    %152 = vector.load %arg14[%c14, %c0_51] : memref<16x128xf32, #tpu.memory_space<vmem>>, vector<2x128xf32>
    %cst_52 = arith.constant dense<0.000000e+00> : vector<2x128xf32>
    %153 = tpu.matmul %150, %1, %cst_52 {dimension_numbers = #tpu.dot_dimension_numbers<[1], [0], [0], [1], [0, 0, 1, 1], [], []>} : vector<2x32xf32>, vector<32x128xf32>, vector<2x128xf32> -> vector<2x128xf32>
    %154 = arith.addf %152, %153 : vector<2x128xf32>
    %155 = vector.extract_strided_slice %154 {offsets = [0, 0], sizes = [2, 96], strides = [1, 1]} : vector<2x128xf32> to vector<2x96xf32>
    %156 = arith.negf %155 : vector<2x96xf32>
    %157 = math.exp %156 : vector<2x96xf32>
    %cst_53 = arith.constant 1.000000e+00 : f32
    %158 = vector.broadcast %cst_53 : f32 to vector<2x96xf32>
    %159 = arith.addf %158, %157 : vector<2x96xf32>
    %160 = arith.divf %158, %159 : vector<2x96xf32>
    %161 = vector.extract_strided_slice %154 {offsets = [0, 96], sizes = [2, 32], strides = [1, 1]} : vector<2x128xf32> to vector<2x32xf32>
    %162 = math.tanh %161 : vector<2x32xf32>
    %163 = vector.extract_strided_slice %160 {offsets = [0, 0], sizes = [2, 32], strides = [1, 1]} : vector<2x96xf32> to vector<2x32xf32>
    %164 = vector.extract_strided_slice %160 {offsets = [0, 32], sizes = [2, 32], strides = [1, 1]} : vector<2x96xf32> to vector<2x32xf32>
    %165 = vector.extract_strided_slice %160 {offsets = [0, 64], sizes = [2, 32], strides = [1, 1]} : vector<2x96xf32> to vector<2x32xf32>
    %166 = arith.mulf %164, %148 : vector<2x32xf32>
    %167 = arith.mulf %163, %162 : vector<2x32xf32>
    %168 = arith.addf %166, %167 : vector<2x32xf32>
    %169 = math.tanh %168 : vector<2x32xf32>
    %170 = arith.mulf %165, %169 : vector<2x32xf32>
    %c14_54 = arith.constant 14 : index
    %c0_55 = arith.constant 0 : index
    %171 = vector.load %arg15[%c14_54, %c0_55] : memref<16x32xf32, #tpu.memory_space<vmem>>, vector<2x32xf32>
    tpu.vector_store %arg15[%c14_54, %c0_55], %170 {strides = array<i32>} : memref<16x32xf32, #tpu.memory_space<vmem>>, vector<2x32xf32>,
    %c0_56 = arith.constant 0 : index
    %c0_57 = arith.constant 0 : index
    %c0_58 = arith.constant 0 : index
    %172 = vector.load %arg12[%c0_56, %c0_57, %c0_58] : memref<2x2x32xf32, #tpu.memory_space<vmem>>, vector<1x2x32xf32>
    %173 = vector.shape_cast %172 : vector<1x2x32xf32> to vector<2x32xf32>
    %174 = vector.shape_cast %170 : vector<2x32xf32> to vector<1x2x32xf32>
    tpu.vector_store %arg12[%c0_56, %c0_57, %c0_58], %174 {strides = array<i32>} : memref<2x2x32xf32, #tpu.memory_space<vmem>>, vector<1x2x32xf32>,
    %c0_59 = arith.constant 0 : index
    %c0_60 = arith.constant 0 : index
    %c0_61 = arith.constant 0 : index
    %175 = vector.load %arg13[%c0_59, %c0_60, %c0_61] : memref<2x2x32xf32, #tpu.memory_space<vmem>>, vector<1x2x32xf32>
    %176 = vector.shape_cast %175 : vector<1x2x32xf32> to vector<2x32xf32>
    %177 = vector.shape_cast %168 : vector<2x32xf32> to vector<1x2x32xf32>
    tpu.vector_store %arg13[%c0_59, %c0_60, %c0_61], %177 {strides = array<i32>} : memref<2x2x32xf32, #tpu.memory_space<vmem>>, vector<1x2x32xf32>,
    %c0_62 = arith.constant 0 : index
    %c0_63 = arith.constant 0 : index
    %178 = vector.load %arg4[%c0_62, %c0_63] : memref<32x128xf32, #tpu.memory_space<vmem>>, vector<32x128xf32>
    %c0_64 = arith.constant 0 : index
    %c0_65 = arith.constant 0 : index
    %179 = vector.load %arg5[%c0_64, %c0_65] : memref<32x128xf32, #tpu.memory_space<vmem>>, vector<32x128xf32>
    %c0_66 = arith.constant 0 : index
    %c0_67 = arith.constant 0 : index
    %180 = vector.load %arg6[%c0_66, %c0_67] : memref<1x128xf32, #tpu.memory_space<vmem>>, vector<1x128xf32>
    %c0_68 = arith.constant 0 : index
    %c0_69 = arith.constant 0 : index
    %181 = vector.load %arg15[%c0_68, %c0_69] : memref<16x32xf32, #tpu.memory_space<vmem>>, vector<16x32xf32>
    %cst_70 = arith.constant dense<0.000000e+00> : vector<16x128xf32>
    %182 = tpu.matmul %181, %178, %cst_70 {dimension_numbers = #tpu.dot_dimension_numbers<[1], [0], [0], [1], [0, 0, 1, 1], [], []>} : vector<16x32xf32>, vector<32x128xf32>, vector<16x128xf32> -> vector<16x128xf32>
    %183 = vector.broadcast %180 : vector<1x128xf32> to vector<16x128xf32>
    %184 = arith.addf %182, %183 : vector<16x128xf32>
    %c0_71 = arith.constant 0 : index
    %c0_72 = arith.constant 0 : index
    %185 = vector.load %arg14[%c0_71, %c0_72] : memref<16x128xf32, #tpu.memory_space<vmem>>, vector<16x128xf32>
    tpu.vector_store %arg14[%c0_71, %c0_72], %184 {strides = array<i32>} : memref<16x128xf32, #tpu.memory_space<vmem>>, vector<16x128xf32>,
    %c1 = arith.constant 1 : index
    %c0_73 = arith.constant 0 : index
    %c0_74 = arith.constant 0 : index
    %186 = vector.load %arg9[%c1, %c0_73, %c0_74] : memref<2x2x32xf32, #tpu.memory_space<vmem>>, vector<1x2x32xf32>
    %187 = vector.shape_cast %186 : vector<1x2x32xf32> to vector<2x32xf32>
    %c1_75 = arith.constant 1 : index
    %c0_76 = arith.constant 0 : index
    %c0_77 = arith.constant 0 : index
    %188 = vector.load %arg10[%c1_75, %c0_76, %c0_77] : memref<2x2x32xf32, #tpu.memory_space<vmem>>, vector<1x2x32xf32>
    %189 = vector.shape_cast %188 : vector<1x2x32xf32> to vector<2x32xf32>
    %c0_78 = arith.constant 0 : index
    %c0_79 = arith.constant 0 : index
    %190 = vector.load %arg14[%c0_78, %c0_79] : memref<16x128xf32, #tpu.memory_space<vmem>>, vector<2x128xf32>
    %cst_80 = arith.constant dense<0.000000e+00> : vector<2x128xf32>
    %191 = tpu.matmul %187, %179, %cst_80 {dimension_numbers = #tpu.dot_dimension_numbers<[1], [0], [0], [1], [0, 0, 1, 1], [], []>} : vector<2x32xf32>, vector<32x128xf32>, vector<2x128xf32> -> vector<2x128xf32>
    %192 = arith.addf %190, %191 : vector<2x128xf32>
    %193 = vector.extract_strided_slice %192 {offsets = [0, 0], sizes = [2, 96], strides = [1, 1]} : vector<2x128xf32> to vector<2x96xf32>
    %194 = arith.negf %193 : vector<2x96xf32>
    %195 = math.exp %194 : vector<2x96xf32>
    %cst_81 = arith.constant 1.000000e+00 : f32
    %196 = vector.broadcast %cst_81 : f32 to vector<2x96xf32>
    %197 = arith.addf %196, %195 : vector<2x96xf32>
    %198 = arith.divf %196, %197 : vector<2x96xf32>
    %199 = vector.extract_strided_slice %192 {offsets = [0, 96], sizes = [2, 32], strides = [1, 1]} : vector<2x128xf32> to vector<2x32xf32>
    %200 = math.tanh %199 : vector<2x32xf32>
    %201 = vector.extract_strided_slice %198 {offsets = [0, 0], sizes = [2, 32], strides = [1, 1]} : vector<2x96xf32> to vector<2x32xf32>
    %202 = vector.extract_strided_slice %198 {offsets = [0, 32], sizes = [2, 32], strides = [1, 1]} : vector<2x96xf32> to vector<2x32xf32>
    %203 = vector.extract_strided_slice %198 {offsets = [0, 64], sizes = [2, 32], strides = [1, 1]} : vector<2x96xf32> to vector<2x32xf32>
    %204 = arith.mulf %202, %189 : vector<2x32xf32>
    %205 = arith.mulf %201, %200 : vector<2x32xf32>
    %206 = arith.addf %204, %205 : vector<2x32xf32>
    %207 = math.tanh %206 : vector<2x32xf32>
    %208 = arith.mulf %203, %207 : vector<2x32xf32>
    %c0_82 = arith.constant 0 : index
    %c0_83 = arith.constant 0 : index
    %209 = vector.load %arg15[%c0_82, %c0_83] : memref<16x32xf32, #tpu.memory_space<vmem>>, vector<2x32xf32>
    tpu.vector_store %arg15[%c0_82, %c0_83], %208 {strides = array<i32>} : memref<16x32xf32, #tpu.memory_space<vmem>>, vector<2x32xf32>,
    %c2_84 = arith.constant 2 : index
    %c0_85 = arith.constant 0 : index
    %210 = vector.load %arg14[%c2_84, %c0_85] : memref<16x128xf32, #tpu.memory_space<vmem>>, vector<2x128xf32>
    %cst_86 = arith.constant dense<0.000000e+00> : vector<2x128xf32>
    %211 = tpu.matmul %208, %179, %cst_86 {dimension_numbers = #tpu.dot_dimension_numbers<[1], [0], [0], [1], [0, 0, 1, 1], [], []>} : vector<2x32xf32>, vector<32x128xf32>, vector<2x128xf32> -> vector<2x128xf32>
    %212 = arith.addf %210, %211 : vector<2x128xf32>
    %213 = vector.extract_strided_slice %212 {offsets = [0, 0], sizes = [2, 96], strides = [1, 1]} : vector<2x128xf32> to vector<2x96xf32>
    %214 = arith.negf %213 : vector<2x96xf32>
    %215 = math.exp %214 : vector<2x96xf32>
    %cst_87 = arith.constant 1.000000e+00 : f32
    %216 = vector.broadcast %cst_87 : f32 to vector<2x96xf32>
    %217 = arith.addf %216, %215 : vector<2x96xf32>
    %218 = arith.divf %216, %217 : vector<2x96xf32>
    %219 = vector.extract_strided_slice %212 {offsets = [0, 96], sizes = [2, 32], strides = [1, 1]} : vector<2x128xf32> to vector<2x32xf32>
    %220 = math.tanh %219 : vector<2x32xf32>
    %221 = vector.extract_strided_slice %218 {offsets = [0, 0], sizes = [2, 32], strides = [1, 1]} : vector<2x96xf32> to vector<2x32xf32>
    %222 = vector.extract_strided_slice %218 {offsets = [0, 32], sizes = [2, 32], strides = [1, 1]} : vector<2x96xf32> to vector<2x32xf32>
    %223 = vector.extract_strided_slice %218 {offsets = [0, 64], sizes = [2, 32], strides = [1, 1]} : vector<2x96xf32> to vector<2x32xf32>
    %224 = arith.mulf %222, %206 : vector<2x32xf32>
    %225 = arith.mulf %221, %220 : vector<2x32xf32>
    %226 = arith.addf %224, %225 : vector<2x32xf32>
    %227 = math.tanh %226 : vector<2x32xf32>
    %228 = arith.mulf %223, %227 : vector<2x32xf32>
    %c2_88 = arith.constant 2 : index
    %c0_89 = arith.constant 0 : index
    %229 = vector.load %arg15[%c2_88, %c0_89] : memref<16x32xf32, #tpu.memory_space<vmem>>, vector<2x32xf32>
    tpu.vector_store %arg15[%c2_88, %c0_89], %228 {strides = array<i32>} : memref<16x32xf32, #tpu.memory_space<vmem>>, vector<2x32xf32>,
    %c4_90 = arith.constant 4 : index
    %c0_91 = arith.constant 0 : index
    %230 = vector.load %arg14[%c4_90, %c0_91] : memref<16x128xf32, #tpu.memory_space<vmem>>, vector<2x128xf32>
    %cst_92 = arith.constant dense<0.000000e+00> : vector<2x128xf32>
    %231 = tpu.matmul %228, %179, %cst_92 {dimension_numbers = #tpu.dot_dimension_numbers<[1], [0], [0], [1], [0, 0, 1, 1], [], []>} : vector<2x32xf32>, vector<32x128xf32>, vector<2x128xf32> -> vector<2x128xf32>
    %232 = arith.addf %230, %231 : vector<2x128xf32>
    %233 = vector.extract_strided_slice %232 {offsets = [0, 0], sizes = [2, 96], strides = [1, 1]} : vector<2x128xf32> to vector<2x96xf32>
    %234 = arith.negf %233 : vector<2x96xf32>
    %235 = math.exp %234 : vector<2x96xf32>
    %cst_93 = arith.constant 1.000000e+00 : f32
    %236 = vector.broadcast %cst_93 : f32 to vector<2x96xf32>
    %237 = arith.addf %236, %235 : vector<2x96xf32>
    %238 = arith.divf %236, %237 : vector<2x96xf32>
    %239 = vector.extract_strided_slice %232 {offsets = [0, 96], sizes = [2, 32], strides = [1, 1]} : vector<2x128xf32> to vector<2x32xf32>
    %240 = math.tanh %239 : vector<2x32xf32>
    %241 = vector.extract_strided_slice %238 {offsets = [0, 0], sizes = [2, 32], strides = [1, 1]} : vector<2x96xf32> to vector<2x32xf32>
    %242 = vector.extract_strided_slice %238 {offsets = [0, 32], sizes = [2, 32], strides = [1, 1]} : vector<2x96xf32> to vector<2x32xf32>
    %243 = vector.extract_strided_slice %238 {offsets = [0, 64], sizes = [2, 32], strides = [1, 1]} : vector<2x96xf32> to vector<2x32xf32>
    %244 = arith.mulf %242, %226 : vector<2x32xf32>
    %245 = arith.mulf %241, %240 : vector<2x32xf32>
    %246 = arith.addf %244, %245 : vector<2x32xf32>
    %247 = math.tanh %246 : vector<2x32xf32>
    %248 = arith.mulf %243, %247 : vector<2x32xf32>
    %c4_94 = arith.constant 4 : index
    %c0_95 = arith.constant 0 : index
    %249 = vector.load %arg15[%c4_94, %c0_95] : memref<16x32xf32, #tpu.memory_space<vmem>>, vector<2x32xf32>
    tpu.vector_store %arg15[%c4_94, %c0_95], %248 {strides = array<i32>} : memref<16x32xf32, #tpu.memory_space<vmem>>, vector<2x32xf32>,
    %c6_96 = arith.constant 6 : index
    %c0_97 = arith.constant 0 : index
    %250 = vector.load %arg14[%c6_96, %c0_97] : memref<16x128xf32, #tpu.memory_space<vmem>>, vector<2x128xf32>
    %cst_98 = arith.constant dense<0.000000e+00> : vector<2x128xf32>
    %251 = tpu.matmul %248, %179, %cst_98 {dimension_numbers = #tpu.dot_dimension_numbers<[1], [0], [0], [1], [0, 0, 1, 1], [], []>} : vector<2x32xf32>, vector<32x128xf32>, vector<2x128xf32> -> vector<2x128xf32>
    %252 = arith.addf %250, %251 : vector<2x128xf32>
    %253 = vector.extract_strided_slice %252 {offsets = [0, 0], sizes = [2, 96], strides = [1, 1]} : vector<2x128xf32> to vector<2x96xf32>
    %254 = arith.negf %253 : vector<2x96xf32>
    %255 = math.exp %254 : vector<2x96xf32>
    %cst_99 = arith.constant 1.000000e+00 : f32
    %256 = vector.broadcast %cst_99 : f32 to vector<2x96xf32>
    %257 = arith.addf %256, %255 : vector<2x96xf32>
    %258 = arith.divf %256, %257 : vector<2x96xf32>
    %259 = vector.extract_strided_slice %252 {offsets = [0, 96], sizes = [2, 32], strides = [1, 1]} : vector<2x128xf32> to vector<2x32xf32>
    %260 = math.tanh %259 : vector<2x32xf32>
    %261 = vector.extract_strided_slice %258 {offsets = [0, 0], sizes = [2, 32], strides = [1, 1]} : vector<2x96xf32> to vector<2x32xf32>
    %262 = vector.extract_strided_slice %258 {offsets = [0, 32], sizes = [2, 32], strides = [1, 1]} : vector<2x96xf32> to vector<2x32xf32>
    %263 = vector.extract_strided_slice %258 {offsets = [0, 64], sizes = [2, 32], strides = [1, 1]} : vector<2x96xf32> to vector<2x32xf32>
    %264 = arith.mulf %262, %246 : vector<2x32xf32>
    %265 = arith.mulf %261, %260 : vector<2x32xf32>
    %266 = arith.addf %264, %265 : vector<2x32xf32>
    %267 = math.tanh %266 : vector<2x32xf32>
    %268 = arith.mulf %263, %267 : vector<2x32xf32>
    %c6_100 = arith.constant 6 : index
    %c0_101 = arith.constant 0 : index
    %269 = vector.load %arg15[%c6_100, %c0_101] : memref<16x32xf32, #tpu.memory_space<vmem>>, vector<2x32xf32>
    tpu.vector_store %arg15[%c6_100, %c0_101], %268 {strides = array<i32>} : memref<16x32xf32, #tpu.memory_space<vmem>>, vector<2x32xf32>,
    %c8_102 = arith.constant 8 : index
    %c0_103 = arith.constant 0 : index
    %270 = vector.load %arg14[%c8_102, %c0_103] : memref<16x128xf32, #tpu.memory_space<vmem>>, vector<2x128xf32>
    %cst_104 = arith.constant dense<0.000000e+00> : vector<2x128xf32>
    %271 = tpu.matmul %268, %179, %cst_104 {dimension_numbers = #tpu.dot_dimension_numbers<[1], [0], [0], [1], [0, 0, 1, 1], [], []>} : vector<2x32xf32>, vector<32x128xf32>, vector<2x128xf32> -> vector<2x128xf32>
    %272 = arith.addf %270, %271 : vector<2x128xf32>
    %273 = vector.extract_strided_slice %272 {offsets = [0, 0], sizes = [2, 96], strides = [1, 1]} : vector<2x128xf32> to vector<2x96xf32>
    %274 = arith.negf %273 : vector<2x96xf32>
    %275 = math.exp %274 : vector<2x96xf32>
    %cst_105 = arith.constant 1.000000e+00 : f32
    %276 = vector.broadcast %cst_105 : f32 to vector<2x96xf32>
    %277 = arith.addf %276, %275 : vector<2x96xf32>
    %278 = arith.divf %276, %277 : vector<2x96xf32>
    %279 = vector.extract_strided_slice %272 {offsets = [0, 96], sizes = [2, 32], strides = [1, 1]} : vector<2x128xf32> to vector<2x32xf32>
    %280 = math.tanh %279 : vector<2x32xf32>
    %281 = vector.extract_strided_slice %278 {offsets = [0, 0], sizes = [2, 32], strides = [1, 1]} : vector<2x96xf32> to vector<2x32xf32>
    %282 = vector.extract_strided_slice %278 {offsets = [0, 32], sizes = [2, 32], strides = [1, 1]} : vector<2x96xf32> to vector<2x32xf32>
    %283 = vector.extract_strided_slice %278 {offsets = [0, 64], sizes = [2, 32], strides = [1, 1]} : vector<2x96xf32> to vector<2x32xf32>
    %284 = arith.mulf %282, %266 : vector<2x32xf32>
    %285 = arith.mulf %281, %280 : vector<2x32xf32>
    %286 = arith.addf %284, %285 : vector<2x32xf32>
    %287 = math.tanh %286 : vector<2x32xf32>
    %288 = arith.mulf %283, %287 : vector<2x32xf32>
    %c8_106 = arith.constant 8 : index
    %c0_107 = arith.constant 0 : index
    %289 = vector.load %arg15[%c8_106, %c0_107] : memref<16x32xf32, #tpu.memory_space<vmem>>, vector<2x32xf32>
    tpu.vector_store %arg15[%c8_106, %c0_107], %288 {strides = array<i32>} : memref<16x32xf32, #tpu.memory_space<vmem>>, vector<2x32xf32>,
    %c10_108 = arith.constant 10 : index
    %c0_109 = arith.constant 0 : index
    %290 = vector.load %arg14[%c10_108, %c0_109] : memref<16x128xf32, #tpu.memory_space<vmem>>, vector<2x128xf32>
    %cst_110 = arith.constant dense<0.000000e+00> : vector<2x128xf32>
    %291 = tpu.matmul %288, %179, %cst_110 {dimension_numbers = #tpu.dot_dimension_numbers<[1], [0], [0], [1], [0, 0, 1, 1], [], []>} : vector<2x32xf32>, vector<32x128xf32>, vector<2x128xf32> -> vector<2x128xf32>
    %292 = arith.addf %290, %291 : vector<2x128xf32>
    %293 = vector.extract_strided_slice %292 {offsets = [0, 0], sizes = [2, 96], strides = [1, 1]} : vector<2x128xf32> to vector<2x96xf32>
    %294 = arith.negf %293 : vector<2x96xf32>
    %295 = math.exp %294 : vector<2x96xf32>
    %cst_111 = arith.constant 1.000000e+00 : f32
    %296 = vector.broadcast %cst_111 : f32 to vector<2x96xf32>
    %297 = arith.addf %296, %295 : vector<2x96xf32>
    %298 = arith.divf %296, %297 : vector<2x96xf32>
    %299 = vector.extract_strided_slice %292 {offsets = [0, 96], sizes = [2, 32], strides = [1, 1]} : vector<2x128xf32> to vector<2x32xf32>
    %300 = math.tanh %299 : vector<2x32xf32>
    %301 = vector.extract_strided_slice %298 {offsets = [0, 0], sizes = [2, 32], strides = [1, 1]} : vector<2x96xf32> to vector<2x32xf32>
    %302 = vector.extract_strided_slice %298 {offsets = [0, 32], sizes = [2, 32], strides = [1, 1]} : vector<2x96xf32> to vector<2x32xf32>
    %303 = vector.extract_strided_slice %298 {offsets = [0, 64], sizes = [2, 32], strides = [1, 1]} : vector<2x96xf32> to vector<2x32xf32>
    %304 = arith.mulf %302, %286 : vector<2x32xf32>
    %305 = arith.mulf %301, %300 : vector<2x32xf32>
    %306 = arith.addf %304, %305 : vector<2x32xf32>
    %307 = math.tanh %306 : vector<2x32xf32>
    %308 = arith.mulf %303, %307 : vector<2x32xf32>
    %c10_112 = arith.constant 10 : index
    %c0_113 = arith.constant 0 : index
    %309 = vector.load %arg15[%c10_112, %c0_113] : memref<16x32xf32, #tpu.memory_space<vmem>>, vector<2x32xf32>
    tpu.vector_store %arg15[%c10_112, %c0_113], %308 {strides = array<i32>} : memref<16x32xf32, #tpu.memory_space<vmem>>, vector<2x32xf32>,
    %c12_114 = arith.constant 12 : index
    %c0_115 = arith.constant 0 : index
    %310 = vector.load %arg14[%c12_114, %c0_115] : memref<16x128xf32, #tpu.memory_space<vmem>>, vector<2x128xf32>
    %cst_116 = arith.constant dense<0.000000e+00> : vector<2x128xf32>
    %311 = tpu.matmul %308, %179, %cst_116 {dimension_numbers = #tpu.dot_dimension_numbers<[1], [0], [0], [1], [0, 0, 1, 1], [], []>} : vector<2x32xf32>, vector<32x128xf32>, vector<2x128xf32> -> vector<2x128xf32>
    %312 = arith.addf %310, %311 : vector<2x128xf32>
    %313 = vector.extract_strided_slice %312 {offsets = [0, 0], sizes = [2, 96], strides = [1, 1]} : vector<2x128xf32> to vector<2x96xf32>
    %314 = arith.negf %313 : vector<2x96xf32>
    %315 = math.exp %314 : vector<2x96xf32>
    %cst_117 = arith.constant 1.000000e+00 : f32
    %316 = vector.broadcast %cst_117 : f32 to vector<2x96xf32>
    %317 = arith.addf %316, %315 : vector<2x96xf32>
    %318 = arith.divf %316, %317 : vector<2x96xf32>
    %319 = vector.extract_strided_slice %312 {offsets = [0, 96], sizes = [2, 32], strides = [1, 1]} : vector<2x128xf32> to vector<2x32xf32>
    %320 = math.tanh %319 : vector<2x32xf32>
    %321 = vector.extract_strided_slice %318 {offsets = [0, 0], sizes = [2, 32], strides = [1, 1]} : vector<2x96xf32> to vector<2x32xf32>
    %322 = vector.extract_strided_slice %318 {offsets = [0, 32], sizes = [2, 32], strides = [1, 1]} : vector<2x96xf32> to vector<2x32xf32>
    %323 = vector.extract_strided_slice %318 {offsets = [0, 64], sizes = [2, 32], strides = [1, 1]} : vector<2x96xf32> to vector<2x32xf32>
    %324 = arith.mulf %322, %306 : vector<2x32xf32>
    %325 = arith.mulf %321, %320 : vector<2x32xf32>
    %326 = arith.addf %324, %325 : vector<2x32xf32>
    %327 = math.tanh %326 : vector<2x32xf32>
    %328 = arith.mulf %323, %327 : vector<2x32xf32>
    %c12_118 = arith.constant 12 : index
    %c0_119 = arith.constant 0 : index
    %329 = vector.load %arg15[%c12_118, %c0_119] : memref<16x32xf32, #tpu.memory_space<vmem>>, vector<2x32xf32>
    tpu.vector_store %arg15[%c12_118, %c0_119], %328 {strides = array<i32>} : memref<16x32xf32, #tpu.memory_space<vmem>>, vector<2x32xf32>,
    %c14_120 = arith.constant 14 : index
    %c0_121 = arith.constant 0 : index
    %330 = vector.load %arg14[%c14_120, %c0_121] : memref<16x128xf32, #tpu.memory_space<vmem>>, vector<2x128xf32>
    %cst_122 = arith.constant dense<0.000000e+00> : vector<2x128xf32>
    %331 = tpu.matmul %328, %179, %cst_122 {dimension_numbers = #tpu.dot_dimension_numbers<[1], [0], [0], [1], [0, 0, 1, 1], [], []>} : vector<2x32xf32>, vector<32x128xf32>, vector<2x128xf32> -> vector<2x128xf32>
    %332 = arith.addf %330, %331 : vector<2x128xf32>
    %333 = vector.extract_strided_slice %332 {offsets = [0, 0], sizes = [2, 96], strides = [1, 1]} : vector<2x128xf32> to vector<2x96xf32>
    %334 = arith.negf %333 : vector<2x96xf32>
    %335 = math.exp %334 : vector<2x96xf32>
    %cst_123 = arith.constant 1.000000e+00 : f32
    %336 = vector.broadcast %cst_123 : f32 to vector<2x96xf32>
    %337 = arith.addf %336, %335 : vector<2x96xf32>
    %338 = arith.divf %336, %337 : vector<2x96xf32>
    %339 = vector.extract_strided_slice %332 {offsets = [0, 96], sizes = [2, 32], strides = [1, 1]} : vector<2x128xf32> to vector<2x32xf32>
    %340 = math.tanh %339 : vector<2x32xf32>
    %341 = vector.extract_strided_slice %338 {offsets = [0, 0], sizes = [2, 32], strides = [1, 1]} : vector<2x96xf32> to vector<2x32xf32>
    %342 = vector.extract_strided_slice %338 {offsets = [0, 32], sizes = [2, 32], strides = [1, 1]} : vector<2x96xf32> to vector<2x32xf32>
    %343 = vector.extract_strided_slice %338 {offsets = [0, 64], sizes = [2, 32], strides = [1, 1]} : vector<2x96xf32> to vector<2x32xf32>
    %344 = arith.mulf %342, %326 : vector<2x32xf32>
    %345 = arith.mulf %341, %340 : vector<2x32xf32>
    %346 = arith.addf %344, %345 : vector<2x32xf32>
    %347 = math.tanh %346 : vector<2x32xf32>
    %348 = arith.mulf %343, %347 : vector<2x32xf32>
    %c14_124 = arith.constant 14 : index
    %c0_125 = arith.constant 0 : index
    %349 = vector.load %arg15[%c14_124, %c0_125] : memref<16x32xf32, #tpu.memory_space<vmem>>, vector<2x32xf32>
    tpu.vector_store %arg15[%c14_124, %c0_125], %348 {strides = array<i32>} : memref<16x32xf32, #tpu.memory_space<vmem>>, vector<2x32xf32>,
    %c1_126 = arith.constant 1 : index
    %c0_127 = arith.constant 0 : index
    %c0_128 = arith.constant 0 : index
    %350 = vector.load %arg12[%c1_126, %c0_127, %c0_128] : memref<2x2x32xf32, #tpu.memory_space<vmem>>, vector<1x2x32xf32>
    %351 = vector.shape_cast %350 : vector<1x2x32xf32> to vector<2x32xf32>
    %352 = vector.shape_cast %348 : vector<2x32xf32> to vector<1x2x32xf32>
    tpu.vector_store %arg12[%c1_126, %c0_127, %c0_128], %352 {strides = array<i32>} : memref<2x2x32xf32, #tpu.memory_space<vmem>>, vector<1x2x32xf32>,
    %c1_129 = arith.constant 1 : index
    %c0_130 = arith.constant 0 : index
    %c0_131 = arith.constant 0 : index
    %353 = vector.load %arg13[%c1_129, %c0_130, %c0_131] : memref<2x2x32xf32, #tpu.memory_space<vmem>>, vector<1x2x32xf32>
    %354 = vector.shape_cast %353 : vector<1x2x32xf32> to vector<2x32xf32>
    %355 = vector.shape_cast %346 : vector<2x32xf32> to vector<1x2x32xf32>
    tpu.vector_store %arg13[%c1_129, %c0_130, %c0_131], %355 {strides = array<i32>} : memref<2x2x32xf32, #tpu.memory_space<vmem>>, vector<1x2x32xf32>,
    %c0_132 = arith.constant 0 : index
    %c0_133 = arith.constant 0 : index
    %356 = vector.load %arg7[%c0_132, %c0_133] : memref<32x16xf32, #tpu.memory_space<vmem>>, vector<32x16xf32>
    %c0_134 = arith.constant 0 : index
    %c0_135 = arith.constant 0 : index
    %357 = vector.load %arg15[%c0_134, %c0_135] : memref<16x32xf32, #tpu.memory_space<vmem>>, vector<16x32xf32>
    %cst_136 = arith.constant dense<0.000000e+00> : vector<16x16xf32>
    %358 = tpu.matmul %357, %356, %cst_136 {dimension_numbers = #tpu.dot_dimension_numbers<[1], [0], [0], [1], [0, 0, 1, 1], [], []>} : vector<16x32xf32>, vector<32x16xf32>, vector<16x16xf32> -> vector<16x16xf32>
    %c0_137 = arith.constant 0 : index
    %c0_138 = arith.constant 0 : index
    %359 = vector.load %arg8[%c0_137, %c0_138] : memref<1x16xf32, #tpu.memory_space<vmem>>, vector<1x16xf32>
    %360 = vector.broadcast %359 : vector<1x16xf32> to vector<16x16xf32>
    %361 = arith.addf %358, %360 : vector<16x16xf32>
    %c0_139 = arith.constant 0 : index
    %c0_140 = arith.constant 0 : index
    %362 = vector.load %arg11[%c0_139, %c0_140] : memref<16x16xf32, #tpu.memory_space<vmem>>, vector<16x16xf32>
    tpu.vector_store %arg11[%c0_139, %c0_140], %361 {strides = array<i32>} : memref<16x16xf32, #tpu.memory_space<vmem>>, vector<16x16xf32>,
    return
  }
}

</mosaic_0001>

<bundles_post_ra>
// kernel: tpu_custom_call.1
= control target key start
LH: loop header
LB: loop body
LE: loop exit
PB: predicated region body
PF: predicated region fallthrough
CT: control target
= control target key end

     0   :  { %19 = vsyncpa [#allocation5], 0  ;;  %s2174_s0 = inlined_call_operand.vmem [shape: f32[16,16], index: 0, kind: input, shape index: {}]   ;;  %s2175_s1 = inlined_call_operand.hbm [shape: f32[16,128], index: 1, kind: input, shape index: {}]   ;;  %s2176_s2 = inlined_call_operand.vmem [shape: f32[32,128], index: 2, kind: input, shape index: {}]   ;;  %s2177_s3 = inlined_call_operand.hbm [shape: f32[1,128], index: 3, kind: input, shape index: {}]   ;;  %s2178_s4 = inlined_call_operand.hbm [shape: f32[32,128], index: 4, kind: input, shape index: {}]   ;;  %s2179_s5 = inlined_call_operand.hbm [shape: f32[32,128], index: 5, kind: input, shape index: {}]   ;;  %s2180_s6 = inlined_call_operand.hbm [shape: f32[1,128], index: 6, kind: input, shape index: {}]   ;;  %s2181_s7 = inlined_call_operand.vmem [shape: f32[32,16], index: 7, kind: input, shape index: {}]   ;;  %s2182_s8 = inlined_call_operand.hbm [shape: f32[1,16], index: 8, kind: input, shape index: {}]   ;;  %s2183_s9 = inlined_call_operand.vmem [shape: f32[2,2,32], index: 9, kind: input, shape index: {}]   ;;  %s2184_s10 = inlined_call_operand.vmem [shape: f32[2,2,32], index: 10, kind: input, shape index: {}]   ;;  %s2185_s11 = inlined_call_operand.hbm [shape: f32[16,16], index: 11, kind: output, shape index: {0}]   ;;  %s2186_s12 = inlined_call_operand.hbm [shape: f32[2,2,32], index: 12, kind: output, shape index: {1}]   ;;  %s2187_s13 = inlined_call_operand.hbm [shape: f32[2,2,32], index: 13, kind: output, shape index: {2}]  }
   0x1   :  { %20 = vsyncpa [#allocation8], 0 }
   0x2   :  { %21 = vsyncpa [#allocation11], 0 }
   0x3   :  { %22 = vsyncpa [#allocation14], 0 }
   0x4   :  { %23 = vsyncpa [#allocation6], 0  ;;  %s47_s27 = sshll.u32 %s2177_s3, 4  ;;  %s48_s27 = int_to_ptr.hbm [resolvable:$true] %s47_s27 }
   0x5   :  { %24 = vsyncpa [#allocation17], 0  ;;  %s1822_s28 = smov [#allocation7]   ;;  %s70_s15 = sshll.u32 %s2179_s5, 4  ;;  %s71_s15 = int_to_ptr.hbm [resolvable:$true] %s70_s15 }
   0x6   :  { %s49_s29 = sshll.u32 %s1822_s28, 4  ;;  %s1823_s16 = smov [#allocation10]   ;;  %s50_s29 = int_to_ptr.vmem [resolvable:$true] %s49_s29 }
   0x7   :  { %52 = dma.hbm_to_vmem [thread:$0]  %s48_s27, 16, %s50_s29, [#allocation8]  }
   0x8   :  { %s72_s17 = sshll.u32 %s1823_s16, 4  ;;  %s31_s20 = sshll.u32 %s2175_s1, 4  ;;  %s73_s17 = int_to_ptr.vmem [resolvable:$true] %s72_s17  ;;  %s32_s20 = int_to_ptr.hbm [resolvable:$true] %s31_s20 }
   0x9   :  { %s1824_s3 = smov 128   ;;  %s1825_s21 = smov 8  }
   0xa   :  { %78 = dma.hbm_to_vmem [thread:$0]  %s71_s15, 512, %s73_s17, [#allocation11], %s1824_s3, %s1824_s3, %s1825_s21  }
   0xb   :  { %s57_s24 = sshll.u32 %s2178_s4, 4  ;;  %s1826_s5 = smov [#allocation4]   ;;  %s58_s24 = int_to_ptr.hbm [resolvable:$true] %s57_s24 }
   0xc   :  { %s33_s25 = sshll.u32 %s1826_s5, 4  ;;  %s1827_s1 = smov [#allocation9]   ;;  %s34_s25 = int_to_ptr.vmem [resolvable:$true] %s33_s25 }
   0xd   :  { %39 = dma.hbm_to_vmem [thread:$0]  %s32_s20, 256, %s34_s25, [#allocation5], %s1824_s3, %s1824_s3, %s1825_s21  }
   0xe   :  { %s59_s26 = sshll.u32 %s1827_s1, 4  ;;  %s84_s29 = sshll.u32 %s2180_s6, 4  ;;  %s60_s26 = int_to_ptr.vmem [resolvable:$true] %s59_s26  ;;  %s85_s29 = int_to_ptr.hbm [resolvable:$true] %s84_s29 }
   0xf   :  { %65 = dma.hbm_to_vmem [thread:$0]  %s58_s24, 512, %s60_s26, [#allocation8], %s1824_s3, %s1824_s3, %s1825_s21  }
  0x10   :  { %s97_s14 = sshll.u32 %s2182_s8, 4  ;;  %s1828_s15 = smov [#allocation12]   ;;  %s98_s14 = int_to_ptr.hbm [resolvable:$true] %s97_s14 }
  0x11   :  { %s86_s16 = sshll.u32 %s1828_s15, 4  ;;  %s1829_s17 = smov [#allocation13]   ;;  %s87_s16 = int_to_ptr.vmem [resolvable:$true] %s86_s16 }
  0x12   :  { %89 = dma.hbm_to_vmem [thread:$0]  %s85_s29, 16, %s87_s16, [#allocation11]  }
  0x13   :  { %s99_s18 = sshll.u32 %s1829_s17, 4  ;;  %s100_s18 = int_to_ptr.vmem [resolvable:$true] %s99_s18 }
  0x14   :  { %102 = dma.hbm_to_vmem [thread:$0]  %s98_s14, 16, %s100_s18, [#allocation14]  }
  0x15   :  { %1810 = dma.done.wait [#allocation5], 256  }
  0x16   :  { %1811 = vsyncadd [#allocation5], 4294967040 }
  0x17   :  { %1812 = dma.done.wait [#allocation8], 528  }
  0x18   :  { %1813 = vsyncadd [#allocation8], 4294966768 }
  0x19   :  { %1814 = dma.done.wait [#allocation11], 528  }
  0x1a   :  { %1815 = vsyncadd [#allocation11], 4294966768 }
  0x1b   :  { %1816 = dma.done.wait [#allocation14], 16  }
  0x1c   :  { %1817 = vsyncadd [#allocation14], 4294967280  ;;  %v132_v0 = vld [vmem:[#allocation4 + $0x8] sm:$0xff]  ;;  %v131_v1 = vld [vmem:[#allocation4] sm:$0xff]  ;;  %vm143_vm0 = vcmask 130048   ;;  %vm178_vm1 = vcmask 261120  }
  0x1d   :  { %164 = vmatpush.msra.mxu0 %v132_v0  ;;  %1446 = vmatpush.msra.mxu1 %v132_v0  ;;  %v138_v2 = vld [vmem:[%s2174_s0] sm:$0xff]  ;;  %v139_v3 = vld [vmem:[%s2174_s0 + $0x8] sm:$0xff]  ;;  %v136_v4 = vld [vmem:[%s2176_s2 + $0x18] sm:$0xff]  ;;  %s1831_s30 = smov 64   ;;  %vm248_vm6 = vcmask 254976   ;;  %s1833_s23 = smov [#allocation16]  }
  0x1e   :  { %265 = vmatpush.msra.mxu2 %v136_v4  ;;  %331 = vmatpush.msra.mxu3 %v136_v4  ;;  %v135_v5 = vld [vmem:[%s2176_s2 + $0x10] sm:$0xff]  ;;  %v134_v6 = vld [vmem:[%s2176_s2 + $0x8] sm:$0xff]  ;;  %v133_v7 = vld [vmem:[%s2176_s2] sm:$0xff]  ;;  %s1830_s2 = smov 32   ;;  %s1366_s24 = sshll.u32 %s1833_s23, 4  ;;  %s1367_s24 = int_to_ptr.vmem [resolvable:$true] %s1366_s24 }
  0x1f   :  { %165 = vmatpush.msra.mxu0 %v131_v1  ;;  %1447 = vmatpush.msra.mxu1 %v131_v1  ;;  %v175_v8 = vld [vmem:[%s2183_s9] sm:$0x3]  ;;  %v1463_v9 = vld [vmem:[#allocation7] ss:$0 sm:$0xff]  ;;  %s1368_s0 = sshll.u32 %s2186_s12, 4  ;;  %s1834_s1 = smov 2   ;;  %s1369_s0 = int_to_ptr.hbm [resolvable:$true] %s1368_s0 }
  0x20   :  { %1406 = vmatmul.msk.f32.vlgmr.msra.gmra.mxu0 %vm143_vm0, %v138_v2  ;;  %1407 = vmatmul.msk.f32.vlgmr.msra.gmra.mxu1 %vm143_vm0, %v139_v3  ;;  %v176_v18 = vld [vmem:[%s2184_s10] sm:$0x3]  ;;  %s1381_s28 = sshll.u32 %s2187_s13, 4  ;;  %s1835_s29 = smov [#allocation18]   ;;  %s1382_s28 = int_to_ptr.hbm [resolvable:$true] %s1381_s28 }
  0x21   :  { %194 = vmatpush.msrb.mxu1 %v136_v4  ;;  %266 = vmatpush.msra.mxu2 %v135_v5  ;;  %s1379_s4 = sshll.u32 %s1835_s29, 4  ;;  %s1836_s12 = smov [#allocation15]   ;;  %s1380_s4 = int_to_ptr.vmem [resolvable:$true] %s1379_s4 }
  0x22   :  { %332 = vmatpush.msra.mxu3 %v135_v5  ;;  %595 = vmatpush.msrb.mxu0 %v136_v4 }
  0x23   :  { %195 = vmatpush.msrb.mxu1 %v135_v5  ;;  %267 = vmatpush.msra.mxu2 %v134_v6 }
  0x24   :  { %333 = vmatpush.msra.mxu3 %v134_v6  ;;  %596 = vmatpush.msrb.mxu0 %v135_v5 }
  0x25   :  { %196 = vmatpush.msrb.mxu1 %v134_v6  ;;  %268 = vmatpush.msra.mxu2 %v133_v7 }
  0x26   :  { %334 = vmatpush.msra.mxu3 %v133_v7  ;;  %597 = vmatpush.msrb.mxu0 %v134_v6 }
  0x27   :  { %463 = vmatpush.msrb.mxu2 %v136_v4  ;;  %197 = vmatpush.msrb.mxu1 %v133_v7 }
  0x28   :  { %529 = vmatpush.msrb.mxu3 %v136_v4  ;;  %1408 = vmatmul.msk.f32.vlgmr.msrb.gmra.mxu1 %vm178_vm1, %v175_v8 }
  0x29   :  { %464 = vmatpush.msrb.mxu2 %v135_v5  ;;  %397 = vmatpush.msra.mxu1 %v136_v4 }
  0x2a   :  { %530 = vmatpush.msrb.mxu3 %v135_v5  ;;  %598 = vmatpush.msrb.mxu0 %v133_v7 }
  0x2b   :  { %465 = vmatpush.msrb.mxu2 %v134_v6  ;;  %398 = vmatpush.msra.mxu1 %v135_v5 }
  0x2c   :  { %531 = vmatpush.msrb.mxu3 %v134_v6 }
  0x2d   :  { %466 = vmatpush.msrb.mxu2 %v133_v7  ;;  %399 = vmatpush.msra.mxu1 %v134_v6 }
  0x2e   :  { %532 = vmatpush.msrb.mxu3 %v133_v7 }
  0x2f   :  { %400 = vmatpush.msra.mxu1 %v133_v7 }
  0x31   :  { %661 = vmatpush.msrb.mxu1 %v136_v4 }
  0x33   :  { %662 = vmatpush.msrb.mxu1 %v135_v5 }
  0x35   :  { %663 = vmatpush.msrb.mxu1 %v134_v6 }
  0x37   :  { %664 = vmatpush.msrb.mxu1 %v133_v7 }
  0x9d   :  { %v167_v10 = vpop.f32.mrf.mxu0  ;;  %v170_v11 = vpop.f32.mrf.mxu1 }
  0x9e   :  { %v168_v12 = vadd.f32 %v1463_v9, %v167_v10  ;;  %v171_v13 = vadd.f32 %v1463_v9, %v170_v11 }
  0xa0   :  { %173 = vst [vmem:[#allocation2] sm:$0xff] %v168_v12 }
  0xa1   :  { %174 = vst [vmem:[#allocation2 + $0x8] sm:$0xff] %v171_v13 }
  0xa5   :  { %v199_v14 = vpop.f32.mrf.mxu1 }
  0xa7   :  { %v177_v15 = vld [vmem:[#allocation2] sm:$0x3]  ;;  %v250_v42 = vld [vmem:[#allocation2 + $0x2] sm:$0x3]  ;;  %v316_v4 = vld [vmem:[#allocation2 + $0x4] sm:$0x3] }
  0xa8   :  { %v202_v16 = vadd.f32 %v199_v14, %v177_v15 }
  0xaa   :  { %1466 = vtanh.f32 %v202_v16  ;;  %v1409_v19 = vmul.f32 -1.442695, %v202_v16 }
  0xac   :  { %1468 = vpow2.f32 %v1409_v19 }
  0xb0   :  { %v1467_v17 = vpop.eup %1466 }
  0xb1   :  { %229 = vrot.lane.b32.xlu0 %v1467_v17, %s1830_s2 }
  0xb2   :  { %v1469_v20 = vpop.eup %1468 }
  0xb3   :  { %v206_v21 = vadd.f32 1.0, %v1469_v20 }
  0xb5   :  { %1470 = vrcp.f32 %v206_v21  ;;  %v218_v27 = vand.u32 2147483648, %v206_v21  ;;  %vm212_vm3 = vweird.f32 %v206_v21  ;;  %v216_v28 = vand.u32 2147483647, %v206_v21 }
  0xb7   :  { %v219_v30 = vor.u32 1.1754944e-38, %v218_v27  ;;  %vm217_vm5 = vcmp.eq.f32.partialorder %v216_v28, 8.507059e+37 }
  0xb9   :  { %224 = vrot.lane.b32.xlu0 %v176_v18, %s1830_s2 }
  0xbb   :  { %v1471_v22 = vpop.eup %1470 }
  0xbc   :  { %v208_v23 = vmul.f32 %v1471_v22, %v206_v21  ;;  %vm213_vm2 = vweird.f32 %v1471_v22 }
  0xbd   :  { %vm214_vm4 = vmor %vm212_vm3, %vm213_vm2 }
  0xbe   :  { %v209_v24 = vsub.f32 1.0, %v208_v23 }
  0xc0   :  { %v210_v25 = vmul.f32 %v1471_v22, %v209_v24 }
  0xc2   :  { %v211_v26 = vadd.f32 %v1471_v22, %v210_v25 }
  0xc4   :  { %v215_v29 = vsel %vm214_vm4, %v1471_v22, %v211_v26 }
  0xc5   :  { %v220_v32 = vsel %vm217_vm5, %v219_v30, %v215_v29  ;;  %v382_v30 = vld [vmem:[#allocation2 + $0x6] sm:$0x3] }
 0x123   :  { %v230_v31 = vpop.permute.xlu0 %229 }
 0x124   :  { %v232_v33 = vmul.f32 %v230_v31, %v220_v32 }
 0x126   :  { %234 = vrot.lane.b32.xlu1 %v232_v33, %s1830_s2 }
 0x12b   :  { %v225_v34 = vpop.permute.xlu0 %224 }
 0x12c   :  { %v227_v35 = vmul.f32 %v225_v34, %v220_v32 }
 0x198   :  { %v235_v36 = vpop.permute.xlu1 %234 }
 0x199   :  { %v237_v37 = vadd.f32 %v235_v36, %v227_v35 }
 0x19b   :  { %1472 = vtanh.f32 %v237_v37 }
 0x1a1   :  { %v1473_v38 = vpop.eup %1472 }
 0x1a2   :  { %240 = vrot.lane.b32.xlu1 %v1473_v38, %s1830_s2 }
 0x214   :  { %v241_v39 = vpop.permute.xlu1 %240 }
 0x215   :  { %v243_v40 = vmul.f32 %v241_v39, %v220_v32 }
 0x217   :  { %245 = vrot.lane.b32.xlu2 %v243_v40, %s1831_s30 }
 0x271   :  { %v246_v41 = vpop.permute.xlu2 %245 }
 0x272   :  { %249 = vst.msk [vmem:[#allocation3] sm:$0x3] %vm248_vm6, %v246_v41  ;;  %1410 = vmatmul.msk.f32.vlgmr.msra.gmra.mxu2 %vm178_vm1, %v246_v41 }
 0x2f5   :  { %v270_v43 = vpop.f32.mrf.mxu2 }
 0x2f6   :  { %v273_v44 = vadd.f32 %v270_v43, %v250_v42 }
 0x2f8   :  { %1474 = vtanh.f32 %v273_v44  ;;  %v1411_v46 = vmul.f32 -1.442695, %v273_v44 }
 0x2fa   :  { %1476 = vpow2.f32 %v1411_v46 }
 0x2fe   :  { %v1475_v45 = vpop.eup %1474 }
 0x2ff   :  { %296 = vrot.lane.b32.xlu2 %v1475_v45, %s1830_s2 }
 0x300   :  { %v1477_v47 = vpop.eup %1476 }
 0x301   :  { %v277_v48 = vadd.f32 1.0, %v1477_v47 }
 0x303   :  { %1478 = vrcp.f32 %v277_v48  ;;  %v289_v54 = vand.u32 2147483648, %v277_v48  ;;  %vm283_vm8 = vweird.f32 %v277_v48  ;;  %v287_v55 = vand.u32 2147483647, %v277_v48 }
 0x305   :  { %v290_v57 = vor.u32 1.1754944e-38, %v289_v54  ;;  %vm288_vm10 = vcmp.eq.f32.partialorder %v287_v55, 8.507059e+37  ;;  %v721_v55 = vld [vmem:[#allocation9 + $0x18] sm:$0xff] }
 0x306   :  { %750 = vmatpush.msra.mxu2 %v721_v55 }
 0x309   :  { %v1479_v49 = vpop.eup %1478 }
 0x30a   :  { %v279_v50 = vmul.f32 %v1479_v49, %v277_v48  ;;  %vm284_vm7 = vweird.f32 %v1479_v49 }
 0x30b   :  { %vm285_vm9 = vmor %vm283_vm8, %vm284_vm7 }
 0x30c   :  { %v280_v51 = vsub.f32 1.0, %v279_v50 }
 0x30e   :  { %v281_v52 = vmul.f32 %v1479_v49, %v280_v51 }
 0x310   :  { %v282_v53 = vadd.f32 %v1479_v49, %v281_v52 }
 0x312   :  { %v286_v56 = vsel %vm285_vm9, %v1479_v49, %v282_v53 }
 0x313   :  { %v291_v59 = vsel %vm288_vm10, %v290_v57, %v286_v56  ;;  %v720_v56 = vld [vmem:[#allocation9 + $0x10] sm:$0xff]  ;;  %v719_v57 = vld [vmem:[#allocation9 + $0x8] sm:$0xff] }
 0x314   :  { %v294_v61 = vmul.f32 %v291_v59, %v237_v37  ;;  %751 = vmatpush.msra.mxu2 %v720_v56 }
 0x316   :  { %752 = vmatpush.msra.mxu2 %v719_v57 }
 0x359   :  { %v297_v58 = vpop.permute.xlu2 %296 }
 0x35a   :  { %v299_v60 = vmul.f32 %v297_v58, %v291_v59  ;;  %v718_v58 = vld [vmem:[#allocation9] sm:$0xff] }
 0x35b   :  { %753 = vmatpush.msra.mxu2 %v718_v58 }
 0x35c   :  { %301 = vrot.lane.b32.xlu0 %v299_v60, %s1830_s2 }
 0x3ce   :  { %v302_v62 = vpop.permute.xlu0 %301 }
 0x3cf   :  { %v304_v63 = vadd.f32 %v302_v62, %v294_v61  ;;  %v448_v61 = vld [vmem:[#allocation2 + $0x8] sm:$0x3] }
 0x3d1   :  { %1480 = vtanh.f32 %v304_v63 }
 0x3d7   :  { %v1481_v0 = vpop.eup %1480 }
 0x3d8   :  { %307 = vrot.lane.b32.xlu1 %v1481_v0, %s1830_s2  ;;  %v1987_v0 = vld [vmem:[#allocation12] ss:$0 sm:$0xff] }
 0x44a   :  { %v308_v1 = vpop.permute.xlu1 %307 }
 0x44b   :  { %v310_v2 = vmul.f32 %v308_v1, %v291_v59 }
 0x44d   :  { %312 = vrot.lane.b32.xlu2 %v310_v2, %s1831_s30 }
 0x4a7   :  { %v313_v3 = vpop.permute.xlu2 %312 }
 0x4a8   :  { %315 = vst.msk [vmem:[#allocation3 + $0x2] sm:$0x3] %vm248_vm6, %v313_v3  ;;  %1412 = vmatmul.msk.f32.vlgmr.msra.gmra.mxu3 %vm178_vm1, %v313_v3 }
 0x52b   :  { %v336_v5 = vpop.f32.mrf.mxu3 }
 0x52c   :  { %v339_v6 = vadd.f32 %v336_v5, %v316_v4 }
 0x52e   :  { %1482 = vtanh.f32 %v339_v6  ;;  %v1413_v8 = vmul.f32 -1.442695, %v339_v6 }
 0x530   :  { %1484 = vpow2.f32 %v1413_v8 }
 0x534   :  { %v1483_v7 = vpop.eup %1482 }
 0x535   :  { %362 = vrot.lane.b32.xlu0 %v1483_v7, %s1830_s2 }
 0x536   :  { %v1485_v9 = vpop.eup %1484 }
 0x537   :  { %v343_v10 = vadd.f32 1.0, %v1485_v9 }
 0x539   :  { %1486 = vrcp.f32 %v343_v10  ;;  %v355_v16 = vand.u32 2147483648, %v343_v10  ;;  %vm349_vm12 = vweird.f32 %v343_v10  ;;  %v353_v17 = vand.u32 2147483647, %v343_v10 }
 0x53b   :  { %v356_v19 = vor.u32 1.1754944e-38, %v355_v16  ;;  %vm354_vm14 = vcmp.eq.f32.partialorder %v353_v17, 8.507059e+37 }
 0x53f   :  { %v1487_v11 = vpop.eup %1486 }
 0x540   :  { %v345_v12 = vmul.f32 %v1487_v11, %v343_v10  ;;  %vm350_vm11 = vweird.f32 %v1487_v11 }
 0x541   :  { %vm351_vm13 = vmor %vm349_vm12, %vm350_vm11 }
 0x542   :  { %v346_v13 = vsub.f32 1.0, %v345_v12 }
 0x544   :  { %v347_v14 = vmul.f32 %v1487_v11, %v346_v13 }
 0x546   :  { %v348_v15 = vadd.f32 %v1487_v11, %v347_v14 }
 0x548   :  { %v352_v18 = vsel %vm351_vm13, %v1487_v11, %v348_v15 }
 0x549   :  { %v357_v21 = vsel %vm354_vm14, %v356_v19, %v352_v18 }
 0x54a   :  { %v360_v23 = vmul.f32 %v357_v21, %v304_v63 }
 0x5a7   :  { %v363_v20 = vpop.permute.xlu0 %362 }
 0x5a8   :  { %v365_v22 = vmul.f32 %v363_v20, %v357_v21 }
 0x5aa   :  { %367 = vrot.lane.b32.xlu1 %v365_v22, %s1830_s2 }
 0x61c   :  { %v368_v24 = vpop.permute.xlu1 %367 }
 0x61d   :  { %v370_v25 = vadd.f32 %v368_v24, %v360_v23 }
 0x61f   :  { %1488 = vtanh.f32 %v370_v25 }
 0x625   :  { %v1489_v26 = vpop.eup %1488 }
 0x626   :  { %373 = vrot.lane.b32.xlu2 %v1489_v26, %s1830_s2  ;;  %v1999_v26 = vld [vmem:[#allocation10 + $0x10] sm:$0xff] }
 0x680   :  { %v374_v27 = vpop.permute.xlu2 %373 }
 0x681   :  { %v376_v28 = vmul.f32 %v374_v27, %v357_v21  ;;  %v2003_v27 = vld [vmem:[#allocation10 + $0x8] sm:$0xff] }
 0x683   :  { %378 = vrot.lane.b32.xlu0 %v376_v28, %s1831_s30  ;;  %v2009_v28 = vld [vmem:[#allocation10] sm:$0xff] }
 0x6f5   :  { %v379_v29 = vpop.permute.xlu0 %378 }
 0x6f6   :  { %381 = vst.msk [vmem:[#allocation3 + $0x4] sm:$0x3] %vm248_vm6, %v379_v29  ;;  %1414 = vmatmul.msk.f32.vlgmr.msra.gmra.mxu1 %vm178_vm1, %v379_v29 }
 0x773   :  { %v402_v31 = vpop.f32.mrf.mxu1 }
 0x774   :  { %v405_v32 = vadd.f32 %v402_v31, %v382_v30  ;;  %v1426_v30 = vld [vmem:[%s2183_s9 + $0x2] sm:$0x3]  ;;  %v514_v31 = vld [vmem:[#allocation2 + $0xa] sm:$0x3]  ;;  %s1355_s9 = sshll.u32 %s2185_s11, 4  ;;  %s1356_s9 = int_to_ptr.hbm [resolvable:$true] %s1355_s9 }
 0x776   :  { %1490 = vtanh.f32 %v405_v32  ;;  %v1415_v34 = vmul.f32 -1.442695, %v405_v32 }
 0x778   :  { %1492 = vpow2.f32 %v1415_v34 }
 0x77c   :  { %v1491_v33 = vpop.eup %1490 }
 0x77d   :  { %428 = vrot.lane.b32.xlu1 %v1491_v33, %s1830_s2 }
 0x77e   :  { %v1493_v35 = vpop.eup %1492 }
 0x77f   :  { %v409_v36 = vadd.f32 1.0, %v1493_v35 }
 0x781   :  { %1494 = vrcp.f32 %v409_v36  ;;  %v421_v42 = vand.u32 2147483648, %v409_v36  ;;  %vm415_vm2 = vweird.f32 %v409_v36  ;;  %v419_v43 = vand.u32 2147483647, %v409_v36 }
 0x783   :  { %v422_v45 = vor.u32 1.1754944e-38, %v421_v42  ;;  %vm420_vm4 = vcmp.eq.f32.partialorder %v419_v43, 8.507059e+37 }
 0x787   :  { %v1495_v37 = vpop.eup %1494 }
 0x788   :  { %v411_v38 = vmul.f32 %v1495_v37, %v409_v36  ;;  %vm416_vm15 = vweird.f32 %v1495_v37 }
 0x789   :  { %vm417_vm3 = vmor %vm415_vm2, %vm416_vm15 }
 0x78a   :  { %v412_v39 = vsub.f32 1.0, %v411_v38  ;;  %v1427_v38 = vld [vmem:[%s2184_s10 + $0x2] sm:$0x3] }
 0x78c   :  { %v413_v40 = vmul.f32 %v1495_v37, %v412_v39 }
 0x78e   :  { %v414_v41 = vadd.f32 %v1495_v37, %v413_v40 }
 0x790   :  { %v418_v44 = vsel %vm417_vm3, %v1495_v37, %v414_v41 }
 0x791   :  { %v423_v47 = vsel %vm420_vm4, %v422_v45, %v418_v44 }
 0x792   :  { %v426_v49 = vmul.f32 %v423_v47, %v370_v25  ;;  %v1997_v25 = vld [vmem:[#allocation10 + $0x18] sm:$0xff] }
 0x793   :  { %783 = vmatpush.msra.mxu3 %v1997_v25  ;;  %853 = vmatpush.msra.mxu0 %v1997_v25 }
 0x794   :  { %919 = vmatpush.msra.mxu1 %v1997_v25 }
 0x795   :  { %784 = vmatpush.msra.mxu3 %v1999_v26  ;;  %854 = vmatpush.msra.mxu0 %v1999_v26 }
 0x796   :  { %920 = vmatpush.msra.mxu1 %v1999_v26 }
 0x797   :  { %785 = vmatpush.msra.mxu3 %v2003_v27  ;;  %855 = vmatpush.msra.mxu0 %v2003_v27 }
 0x798   :  { %921 = vmatpush.msra.mxu1 %v2003_v27 }
 0x799   :  { %786 = vmatpush.msra.mxu3 %v2009_v28  ;;  %856 = vmatpush.msra.mxu0 %v2009_v28 }
 0x79a   :  { %922 = vmatpush.msra.mxu1 %v2009_v28 }
 0x7ef   :  { %v429_v46 = vpop.permute.xlu1 %428 }
 0x7f0   :  { %v431_v48 = vmul.f32 %v429_v46, %v423_v47 }
 0x7f2   :  { %433 = vrot.lane.b32.xlu2 %v431_v48, %s1830_s2 }
 0x84c   :  { %v434_v50 = vpop.permute.xlu2 %433 }
 0x84d   :  { %v436_v51 = vadd.f32 %v434_v50, %v426_v49 }
 0x84f   :  { %1496 = vtanh.f32 %v436_v51 }
 0x855   :  { %v1497_v52 = vpop.eup %1496 }
 0x856   :  { %439 = vrot.lane.b32.xlu0 %v1497_v52, %s1830_s2 }
 0x8c8   :  { %v440_v53 = vpop.permute.xlu0 %439 }
 0x8c9   :  { %v442_v54 = vmul.f32 %v440_v53, %v423_v47 }
 0x8cb   :  { %444 = vrot.lane.b32.xlu1 %v442_v54, %s1831_s30 }
 0x93d   :  { %v445_v59 = vpop.permute.xlu1 %444 }
 0x93e   :  { %447 = vst.msk [vmem:[#allocation3 + $0x6] sm:$0x3] %vm248_vm6, %v445_v59  ;;  %1416 = vmatmul.msk.f32.vlgmr.msrb.gmra.mxu2 %vm178_vm1, %v445_v59 }
 0x93f   :  { %1183 = vmatpush.msrb.mxu2 %v1997_v25 }
 0x941   :  { %1184 = vmatpush.msrb.mxu2 %v1999_v26 }
 0x943   :  { %1185 = vmatpush.msrb.mxu2 %v2003_v27 }
 0x945   :  { %v727_v60 = vld [vmem:[#allocation3] sm:$0xff]  ;;  %1186 = vmatpush.msrb.mxu2 %v2009_v28 }
 0x946   :  { %1424 = vmatmul.msk.f32.vlgmr.msra.gmra.mxu2 %vm178_vm1, %v727_v60 }
 0x9c1   :  { %v468_v62 = vpop.f32.mrf.mxu2 }
 0x9c2   :  { %v471_v63 = vadd.f32 %v468_v62, %v448_v61 }
 0x9c4   :  { %1498 = vtanh.f32 %v471_v63  ;;  %v1417_v4 = vmul.f32 -1.442695, %v471_v63 }
 0x9c6   :  { %1500 = vpow2.f32 %v1417_v4 }
 0x9c9   :  { %v755_v1 = vpop.f32.mrf.mxu2 }
 0x9ca   :  { %v1499_v2 = vpop.eup %1498  ;;  %v756_v3 = vadd.f32 %v1987_v0, %v755_v1 }
 0x9cb   :  { %494 = vrot.lane.b32.xlu2 %v1499_v2, %s1830_s2 }
 0x9cc   :  { %761 = vst [vmem:[#allocation2] sm:$0xff] %v756_v3  ;;  %v1501_v5 = vpop.eup %1500 }
 0x9cd   :  { %v475_v6 = vadd.f32 1.0, %v1501_v5 }
 0x9cf   :  { %1502 = vrcp.f32 %v475_v6  ;;  %v487_v12 = vand.u32 2147483648, %v475_v6  ;;  %vm481_vm7 = vweird.f32 %v475_v6  ;;  %v485_v13 = vand.u32 2147483647, %v475_v6 }
 0x9d1   :  { %v488_v15 = vor.u32 1.1754944e-38, %v487_v12  ;;  %vm486_vm9 = vcmp.eq.f32.partialorder %v485_v13, 8.507059e+37 }
 0x9d3   :  { %v767_v34 = vld [vmem:[#allocation2] sm:$0x3] }
 0x9d5   :  { %v1503_v7 = vpop.eup %1502 }
 0x9d6   :  { %v477_v8 = vmul.f32 %v1503_v7, %v475_v6  ;;  %vm482_vm5 = vweird.f32 %v1503_v7 }
 0x9d7   :  { %vm483_vm8 = vmor %vm481_vm7, %vm482_vm5 }
 0x9d8   :  { %v478_v9 = vsub.f32 1.0, %v477_v8 }
 0x9da   :  { %v479_v10 = vmul.f32 %v1503_v7, %v478_v9 }
 0x9dc   :  { %v480_v11 = vadd.f32 %v1503_v7, %v479_v10 }
 0x9de   :  { %v484_v14 = vsel %vm483_vm8, %v1503_v7, %v480_v11 }
 0x9df   :  { %v489_v17 = vsel %vm486_vm9, %v488_v15, %v484_v14 }
 0x9e0   :  { %v492_v19 = vmul.f32 %v489_v17, %v436_v51 }
 0xa25   :  { %v495_v16 = vpop.permute.xlu2 %494 }
 0xa26   :  { %v497_v18 = vmul.f32 %v495_v16, %v489_v17 }
 0xa28   :  { %499 = vrot.lane.b32.xlu0 %v497_v18, %s1830_s2 }
 0xa9a   :  { %v500_v20 = vpop.permute.xlu0 %499 }
 0xa9b   :  { %v1992_v21 = vadd.f32 %v500_v20, %v492_v19 }
 0xa9d   :  { %1504 = vtanh.f32 %v1992_v21 }
 0xaa3   :  { %v1505_v22 = vpop.eup %1504 }
 0xaa4   :  { %505 = vrot.lane.b32.xlu1 %v1505_v22, %s1830_s2  ;;  %v580_v22 = vld [vmem:[#allocation2 + $0xc] sm:$0x3] }
 0xb16   :  { %v506_v23 = vpop.permute.xlu1 %505 }
 0xb17   :  { %v508_v24 = vmul.f32 %v506_v23, %v489_v17 }
 0xb19   :  { %510 = vrot.lane.b32.xlu2 %v508_v24, %s1831_s30 }
 0xb73   :  { %v511_v29 = vpop.permute.xlu2 %510 }
 0xb74   :  { %513 = vst.msk [vmem:[#allocation3 + $0x8] sm:$0x3] %vm248_vm6, %v511_v29  ;;  %1418 = vmatmul.msk.f32.vlgmr.msrb.gmra.mxu3 %vm178_vm1, %v511_v29 }
 0xb75   :  { %985 = vmatpush.msrb.mxu3 %v1997_v25 }
 0xb77   :  { %986 = vmatpush.msrb.mxu3 %v1999_v26 }
 0xb79   :  { %987 = vmatpush.msrb.mxu3 %v2003_v27 }
 0xb7b   :  { %988 = vmatpush.msrb.mxu3 %v2009_v28 }
 0xb7c   :  { %1428 = vmatmul.msk.f32.vlgmr.msra.gmra.mxu3 %vm178_vm1, %v1426_v30  ;;  %v838_v30 = vld [vmem:[#allocation2 + $0x2] sm:$0x3] }
 0xb7d   :  { %1249 = vmatpush.msra.mxu3 %v1997_v25 }
 0xb7f   :  { %1250 = vmatpush.msra.mxu3 %v1999_v26 }
 0xb81   :  { %1251 = vmatpush.msra.mxu3 %v2003_v27 }
 0xb83   :  { %1252 = vmatpush.msra.mxu3 %v2009_v28 }
 0xbf7   :  { %v534_v32 = vpop.f32.mrf.mxu3 }
 0xbf8   :  { %v537_v33 = vadd.f32 %v534_v32, %v514_v31 }
 0xbfa   :  { %1506 = vtanh.f32 %v537_v33  ;;  %v1419_v40 = vmul.f32 -1.442695, %v537_v33 }
 0xbff   :  { %v788_v35 = vpop.f32.mrf.mxu3 }
 0xc00   :  { %v1507_v36 = vpop.eup %1506  ;;  %v791_v37 = vadd.f32 %v788_v35, %v767_v34 }
 0xc01   :  { %560 = vrot.lane.b32.xlu0 %v1507_v36, %s1830_s2 }
 0xc02   :  { %1508 = vtanh.f32 %v791_v37  ;;  %v1429_v41 = vmul.f32 -1.442695, %v791_v37 }
 0xc03   :  { %1510 = vpow2.f32 %v1419_v40 }
 0xc04   :  { %1512 = vpow2.f32 %v1429_v41 }
 0xc08   :  { %v1509_v39 = vpop.eup %1508 }
 0xc09   :  { %813 = vrot.lane.b32.xlu0 %v1427_v38, %s1830_s2  ;;  %818 = vrot.lane.b32.xlu1 %v1509_v39, %s1830_s2  ;;  %v1511_v42 = vpop.eup %1510 }
 0xc0a   :  { %v541_v43 = vadd.f32 1.0, %v1511_v42  ;;  %v1513_v44 = vpop.eup %1512 }
 0xc0b   :  { %v795_v45 = vadd.f32 1.0, %v1513_v44 }
 0xc0c   :  { %1514 = vrcp.f32 %v541_v43  ;;  %v553_v54 = vand.u32 2147483648, %v541_v43  ;;  %vm547_vm11 = vweird.f32 %v541_v43  ;;  %v551_v55 = vand.u32 2147483647, %v541_v43 }
 0xc0d   :  { %1516 = vrcp.f32 %v795_v45  ;;  %v807_v63 = vand.u32 2147483648, %v795_v45  ;;  %vm801_vm15 = vweird.f32 %v795_v45  ;;  %v805_v1 = vand.u32 2147483647, %v795_v45 }
 0xc0e   :  { %v554_v58 = vor.u32 1.1754944e-38, %v553_v54  ;;  %vm552_vm13 = vcmp.eq.f32.partialorder %v551_v55, 8.507059e+37 }
 0xc0f   :  { %v808_v3 = vor.u32 1.1754944e-38, %v807_v63  ;;  %vm806_vm3 = vcmp.eq.f32.partialorder %v805_v1, 8.507059e+37 }
 0xc12   :  { %v1515_v46 = vpop.eup %1514 }
 0xc13   :  { %v543_v47 = vmul.f32 %v1515_v46, %v541_v43  ;;  %v1517_v49 = vpop.eup %1516  ;;  %vm548_vm10 = vweird.f32 %v1515_v46 }
 0xc14   :  { %v797_v51 = vmul.f32 %v1517_v49, %v795_v45  ;;  %vm549_vm12 = vmor %vm547_vm11, %vm548_vm10  ;;  %vm802_vm14 = vweird.f32 %v1517_v49 }
 0xc15   :  { %v544_v48 = vsub.f32 1.0, %v543_v47  ;;  %vm803_vm2 = vmor %vm801_vm15, %vm802_vm14 }
 0xc16   :  { %v798_v53 = vsub.f32 1.0, %v797_v51 }
 0xc17   :  { %v545_v50 = vmul.f32 %v1515_v46, %v544_v48 }
 0xc18   :  { %v799_v57 = vmul.f32 %v1517_v49, %v798_v53 }
 0xc19   :  { %v546_v52 = vadd.f32 %v1515_v46, %v545_v50 }
 0xc1a   :  { %v800_v62 = vadd.f32 %v1517_v49, %v799_v57 }
 0xc1b   :  { %v550_v56 = vsel %vm549_vm12, %v1515_v46, %v546_v52 }
 0xc1c   :  { %v555_v60 = vsel %vm552_vm13, %v554_v58, %v550_v56  ;;  %v804_v2 = vsel %vm803_vm2, %v1517_v49, %v800_v62 }
 0xc1d   :  { %v809_v4 = vsel %vm806_vm3, %v808_v3, %v804_v2  ;;  %v558_v7 = vmul.f32 %v555_v60, %v1992_v21 }
 0xc73   :  { %v561_v59 = vpop.permute.xlu0 %560 }
 0xc74   :  { %v563_v61 = vmul.f32 %v561_v59, %v555_v60 }
 0xc76   :  { %565 = vrot.lane.b32.xlu2 %v563_v61, %s1830_s2 }
 0xc7b   :  { %v819_v5 = vpop.permute.xlu1 %818  ;;  %v814_v11 = vpop.permute.xlu0 %813 }
 0xc7c   :  { %v821_v6 = vmul.f32 %v819_v5, %v809_v4  ;;  %v816_v12 = vmul.f32 %v814_v11, %v809_v4 }
 0xc7e   :  { %823 = vrot.lane.b32.xlu1 %v821_v6, %s1830_s2 }
 0xcd0   :  { %v566_v8 = vpop.permute.xlu2 %565 }
 0xcd1   :  { %v2044_v9 = vadd.f32 %v566_v8, %v558_v7 }
 0xcd3   :  { %1518 = vtanh.f32 %v2044_v9 }
 0xcd9   :  { %v1519_v10 = vpop.eup %1518 }
 0xcda   :  { %571 = vrot.lane.b32.xlu2 %v1519_v10, %s1830_s2 }
 0xcf0   :  { %v824_v13 = vpop.permute.xlu1 %823 }
 0xcf1   :  { %v2048_v14 = vadd.f32 %v824_v13, %v816_v12 }
 0xcf3   :  { %1520 = vtanh.f32 %v2048_v14 }
 0xcf9   :  { %v1521_v15 = vpop.eup %1520 }
 0xcfa   :  { %829 = vrot.lane.b32.xlu0 %v1521_v15, %s1830_s2 }
 0xd34   :  { %v572_v16 = vpop.permute.xlu2 %571 }
 0xd35   :  { %v574_v17 = vmul.f32 %v572_v16, %v555_v60  ;;  %v904_v16 = vld [vmem:[#allocation2 + $0x4] sm:$0x3] }
 0xd37   :  { %576 = vrot.lane.b32.xlu1 %v574_v17, %s1831_s30 }
 0xd6c   :  { %v830_v18 = vpop.permute.xlu0 %829 }
 0xd6d   :  { %v832_v19 = vmul.f32 %v830_v18, %v809_v4 }
 0xd6f   :  { %834 = vrot.lane.b32.xlu2 %v832_v19, %s1831_s30 }
 0xda9   :  { %v577_v20 = vpop.permute.xlu1 %576 }
 0xdaa   :  { %579 = vst.msk [vmem:[#allocation3 + $0xa] sm:$0x3] %vm248_vm6, %v577_v20  ;;  %1420 = vmatmul.msk.f32.vlgmr.msrb.gmra.mxu0 %vm178_vm1, %v577_v20 }
 0xdab   :  { %1051 = vmatpush.msrb.mxu0 %v1997_v25 }
 0xdad   :  { %1052 = vmatpush.msrb.mxu0 %v1999_v26 }
 0xdaf   :  { %1053 = vmatpush.msrb.mxu0 %v2003_v27 }
 0xdb1   :  { %1054 = vmatpush.msrb.mxu0 %v2009_v28 }
 0xdc9   :  { %v835_v21 = vpop.permute.xlu2 %834 }
 0xdca   :  { %837 = vst.msk [vmem:[#allocation3] sm:$0x3] %vm248_vm6, %v835_v21  ;;  %1430 = vmatmul.msk.f32.vlgmr.msra.gmra.mxu0 %vm178_vm1, %v835_v21 }
 0xe27   :  { %v600_v23 = vpop.f32.mrf.mxu0 }
 0xe28   :  { %v603_v24 = vadd.f32 %v600_v23, %v580_v22 }
 0xe2a   :  { %1522 = vtanh.f32 %v603_v24  ;;  %v1421_v34 = vmul.f32 -1.442695, %v603_v24 }
 0xe30   :  { %v1523_v29 = vpop.eup %1522 }
 0xe31   :  { %626 = vrot.lane.b32.xlu0 %v1523_v29, %s1830_s2 }
 0xe47   :  { %v858_v31 = vpop.f32.mrf.mxu0 }
 0xe48   :  { %v861_v32 = vadd.f32 %v858_v31, %v838_v30 }
 0xe4a   :  { %1524 = vtanh.f32 %v861_v32  ;;  %v1431_v40 = vmul.f32 -1.442695, %v861_v32  ;;  %v646_v32 = vld [vmem:[#allocation2 + $0xe] sm:$0x3] }
 0xe4b   :  { %1526 = vpow2.f32 %v1421_v34 }
 0xe50   :  { %v1525_v33 = vpop.eup %1524 }
 0xe51   :  { %884 = vrot.lane.b32.xlu1 %v1525_v33, %s1830_s2  ;;  %v1527_v35 = vpop.eup %1526 }
 0xe52   :  { %v607_v36 = vadd.f32 1.0, %v1527_v35 }
 0xe54   :  { %1528 = vrcp.f32 %v607_v36  ;;  %v619_v43 = vand.u32 2147483648, %v607_v36  ;;  %vm613_vm5 = vweird.f32 %v607_v36  ;;  %v617_v44 = vand.u32 2147483647, %v607_v36 }
 0xe55   :  { %1530 = vpow2.f32 %v1431_v40 }
 0xe56   :  { %v620_v47 = vor.u32 1.1754944e-38, %v619_v43  ;;  %vm618_vm8 = vcmp.eq.f32.partialorder %v617_v44, 8.507059e+37 }
 0xe5a   :  { %v1529_v37 = vpop.eup %1528 }
 0xe5b   :  { %v609_v38 = vmul.f32 %v1529_v37, %v607_v36  ;;  %vm614_vm4 = vweird.f32 %v1529_v37  ;;  %v1531_v45 = vpop.eup %1530 }
 0xe5c   :  { %vm615_vm7 = vmor %vm613_vm5, %vm614_vm4  ;;  %v865_v48 = vadd.f32 1.0, %v1531_v45 }
 0xe5d   :  { %v610_v39 = vsub.f32 1.0, %v609_v38 }
 0xe5e   :  { %1532 = vrcp.f32 %v865_v48  ;;  %v877_v57 = vand.u32 2147483648, %v865_v48  ;;  %vm871_vm10 = vweird.f32 %v865_v48  ;;  %v875_v58 = vand.u32 2147483647, %v865_v48 }
 0xe5f   :  { %v611_v41 = vmul.f32 %v1529_v37, %v610_v39 }
 0xe60   :  { %v878_v60 = vor.u32 1.1754944e-38, %v877_v57  ;;  %vm876_vm12 = vcmp.eq.f32.partialorder %v875_v58, 8.507059e+37 }
 0xe61   :  { %v612_v42 = vadd.f32 %v1529_v37, %v611_v41 }
 0xe63   :  { %v616_v46 = vsel %vm615_vm7, %v1529_v37, %v612_v42 }
 0xe64   :  { %v621_v49 = vsel %vm618_vm8, %v620_v47, %v616_v46  ;;  %v1533_v52 = vpop.eup %1532 }
 0xe65   :  { %v867_v53 = vmul.f32 %v1533_v52, %v865_v48  ;;  %vm872_vm9 = vweird.f32 %v1533_v52  ;;  %v624_v1 = vmul.f32 %v621_v49, %v2044_v9 }
 0xe66   :  { %vm873_vm11 = vmor %vm871_vm10, %vm872_vm9 }
 0xe67   :  { %v868_v54 = vsub.f32 1.0, %v867_v53 }
 0xe69   :  { %v869_v55 = vmul.f32 %v1533_v52, %v868_v54 }
 0xe6b   :  { %v870_v56 = vadd.f32 %v1533_v52, %v869_v55 }
 0xe6d   :  { %v874_v59 = vsel %vm873_vm11, %v1533_v52, %v870_v56 }
 0xe6e   :  { %v879_v62 = vsel %vm876_vm12, %v878_v60, %v874_v59  ;;  %v970_v60 = vld [vmem:[#allocation2 + $0x6] sm:$0x3] }
 0xe6f   :  { %v882_v5 = vmul.f32 %v879_v62, %v2048_v14 }
 0xea3   :  { %v627_v50 = vpop.permute.xlu0 %626 }
 0xea4   :  { %v629_v51 = vmul.f32 %v627_v50, %v621_v49 }
 0xea6   :  { %631 = vrot.lane.b32.xlu2 %v629_v51, %s1830_s2 }
 0xec3   :  { %v885_v61 = vpop.permute.xlu1 %884 }
 0xec4   :  { %v887_v63 = vmul.f32 %v885_v61, %v879_v62 }
 0xec6   :  { %889 = vrot.lane.b32.xlu0 %v887_v63, %s1830_s2 }
 0xf00   :  { %v632_v2 = vpop.permute.xlu2 %631 }
 0xf01   :  { %v2067_v3 = vadd.f32 %v632_v2, %v624_v1 }
 0xf03   :  { %1534 = vtanh.f32 %v2067_v3 }
 0xf09   :  { %v1535_v4 = vpop.eup %1534 }
 0xf0a   :  { %637 = vrot.lane.b32.xlu1 %v1535_v4, %s1830_s2 }
 0xf38   :  { %v890_v6 = vpop.permute.xlu0 %889 }
 0xf39   :  { %v892_v7 = vadd.f32 %v890_v6, %v882_v5 }
 0xf3b   :  { %1536 = vtanh.f32 %v892_v7 }
 0xf41   :  { %v1537_v8 = vpop.eup %1536 }
 0xf42   :  { %895 = vrot.lane.b32.xlu2 %v1537_v8, %s1830_s2 }
 0xf7c   :  { %v638_v10 = vpop.permute.xlu1 %637 }
 0xf7d   :  { %v640_v11 = vmul.f32 %v638_v10, %v621_v49 }
 0xf7f   :  { %642 = vrot.lane.b32.xlu0 %v640_v11, %s1831_s30 }
 0xf9c   :  { %v896_v9 = vpop.permute.xlu2 %895 }
 0xf9d   :  { %v898_v12 = vmul.f32 %v896_v9, %v879_v62 }
 0xf9f   :  { %900 = vrot.lane.b32.xlu1 %v898_v12, %s1831_s30 }
 0xff1   :  { %v643_v13 = vpop.permute.xlu0 %642 }
 0xff2   :  { %645 = vst.msk [vmem:[#allocation3 + $0xc] sm:$0x3] %vm248_vm6, %v643_v13  ;;  %1422 = vmatmul.msk.f32.vlgmr.msrb.gmra.mxu1 %vm178_vm1, %v643_v13 }
 0xff3   :  { %1117 = vmatpush.msrb.mxu1 %v1997_v25 }
 0xff5   :  { %1118 = vmatpush.msrb.mxu1 %v1999_v26 }
 0xff7   :  { %1119 = vmatpush.msrb.mxu1 %v2003_v27 }
 0xff9   :  { %1120 = vmatpush.msrb.mxu1 %v2009_v28 }
0x1011   :  { %v901_v14 = vpop.permute.xlu1 %900 }
0x1012   :  { %903 = vst.msk [vmem:[#allocation3 + $0x2] sm:$0x3] %vm248_vm6, %v901_v14  ;;  %1432 = vmatmul.msk.f32.vlgmr.msra.gmra.mxu1 %vm178_vm1, %v901_v14 }
0x106f   :  { %v666_v15 = vpop.f32.mrf.mxu1 }
0x1070   :  { %v669_v33 = vadd.f32 %v666_v15, %v646_v32  ;;  %v1311_v32 = vld [vmem:[%s2181_s7 + $0x18] sm:$0xff] }
0x1071   :  { %1336 = vmatpush.msra.mxu0 %v1311_v32 }
0x1072   :  { %v1423_v42 = vmul.f32 -1.442695, %v669_v33 }
0x108f   :  { %v924_v17 = vpop.f32.mrf.mxu1 }
0x1090   :  { %v927_v18 = vadd.f32 %v924_v17, %v904_v16 }
0x1092   :  { %1538 = vtanh.f32 %v927_v18  ;;  %v1433_v25 = vmul.f32 -1.442695, %v927_v18 }
0x1094   :  { %1540 = vpow2.f32 %v1433_v25 }
0x1098   :  { %v1539_v19 = vpop.eup %1538 }
0x1099   :  { %950 = vrot.lane.b32.xlu2 %v1539_v19, %s1830_s2 }
0x109a   :  { %v1541_v26 = vpop.eup %1540 }
0x109b   :  { %v931_v20 = vadd.f32 1.0, %v1541_v26 }
0x109d   :  { %1542 = vrcp.f32 %v931_v20  ;;  %v943_v24 = vand.u32 2147483648, %v931_v20  ;;  %vm937_vm14 = vweird.f32 %v931_v20  ;;  %v941_v29 = vand.u32 2147483647, %v931_v20 }
0x109e   :  { %1544 = vtanh.f32 %v669_v33  ;;  %v1310_v33 = vld [vmem:[%s2181_s7 + $0x10] sm:$0xff] }
0x109f   :  { %v944_v31 = vor.u32 1.1754944e-38, %v943_v24  ;;  %vm942_vm2 = vcmp.eq.f32.partialorder %v941_v29, 8.507059e+37  ;;  %1337 = vmatpush.msra.mxu0 %v1310_v33 }
0x10a3   :  { %v1543_v27 = vpop.eup %1542 }
0x10a4   :  { %v933_v28 = vmul.f32 %v1543_v27, %v931_v20  ;;  %vm938_vm13 = vweird.f32 %v1543_v27  ;;  %v1545_v37 = vpop.eup %1544 }
0x10a5   :  { %vm939_vm15 = vmor %vm937_vm14, %vm938_vm13 }
0x10a6   :  { %v934_v21 = vsub.f32 1.0, %v933_v28 }
0x10a8   :  { %v935_v22 = vmul.f32 %v1543_v27, %v934_v21 }
0x10aa   :  { %v936_v23 = vadd.f32 %v1543_v27, %v935_v22 }
0x10ac   :  { %v940_v30 = vsel %vm939_vm15, %v1543_v27, %v936_v23 }
0x10ad   :  { %v945_v35 = vsel %vm942_vm2, %v944_v31, %v940_v30 }
0x10ae   :  { %v948_v38 = vmul.f32 %v945_v35, %v892_v7 }
0x10f3   :  { %v951_v34 = vpop.permute.xlu2 %950 }
0x10f4   :  { %v953_v36 = vmul.f32 %v951_v34, %v945_v35  ;;  %v1309_v34 = vld [vmem:[%s2181_s7 + $0x8] sm:$0xff] }
0x10f5   :  { %1338 = vmatpush.msra.mxu0 %v1309_v34 }
0x10f6   :  { %955 = vrot.lane.b32.xlu0 %v953_v36, %s1830_s2 }
0x10fe   :  { %692 = vrot.lane.b32.xlu0 %v1545_v37, %s1830_s2 }
0x1168   :  { %v956_v39 = vpop.permute.xlu0 %955 }
0x1169   :  { %v2086_v40 = vadd.f32 %v956_v39, %v948_v38 }
0x116b   :  { %1546 = vtanh.f32 %v2086_v40 }
0x116c   :  { %1548 = vpow2.f32 %v1423_v42 }
0x1170   :  { %v693_v55 = vpop.permute.xlu0 %692 }
0x1171   :  { %v1547_v41 = vpop.eup %1546 }
0x1172   :  { %961 = vrot.lane.b32.xlu1 %v1547_v41, %s1830_s2  ;;  %v1549_v43 = vpop.eup %1548 }
0x1173   :  { %v673_v44 = vadd.f32 1.0, %v1549_v43 }
0x1175   :  { %1550 = vrcp.f32 %v673_v44  ;;  %v685_v52 = vand.u32 2147483648, %v673_v44  ;;  %vm679_vm4 = vweird.f32 %v673_v44  ;;  %v683_v53 = vand.u32 2147483647, %v673_v44 }
0x1177   :  { %v686_v56 = vor.u32 1.1754944e-38, %v685_v52  ;;  %vm684_vm7 = vcmp.eq.f32.partialorder %v683_v53, 8.507059e+37 }
0x117b   :  { %v1551_v45 = vpop.eup %1550 }
0x117c   :  { %v675_v46 = vmul.f32 %v1551_v45, %v673_v44  ;;  %vm680_vm3 = vweird.f32 %v1551_v45 }
0x117d   :  { %vm681_vm5 = vmor %vm679_vm4, %vm680_vm3 }
0x117e   :  { %v676_v47 = vsub.f32 1.0, %v675_v46 }
0x1180   :  { %v677_v48 = vmul.f32 %v1551_v45, %v676_v47 }
0x1182   :  { %v678_v50 = vadd.f32 %v1551_v45, %v677_v48 }
0x1184   :  { %v682_v54 = vsel %vm681_vm5, %v1551_v45, %v678_v50 }
0x1185   :  { %v687_v57 = vsel %vm684_vm7, %v686_v56, %v682_v54 }
0x1186   :  { %v695_v58 = vmul.f32 %v693_v55, %v687_v57  ;;  %v690_v1 = vmul.f32 %v687_v57, %v2067_v3 }
0x11e4   :  { %v962_v49 = vpop.permute.xlu1 %961 }
0x11e5   :  { %v964_v51 = vmul.f32 %v962_v49, %v945_v35  ;;  %v1308_v35 = vld [vmem:[%s2181_s7] sm:$0xff]  ;;  %s1832_s7 = smov 96  }
0x11e6   :  { %1339 = vmatpush.msra.mxu0 %v1308_v35 }
0x11e7   :  { %966 = vrot.lane.b32.xlu2 %v964_v51, %s1831_s30 }
0x11ef   :  { %697 = vrot.lane.b32.xlu2 %v695_v58, %s1830_s2 }
0x1241   :  { %v967_v59 = vpop.permute.xlu2 %966 }
0x1242   :  { %969 = vst.msk [vmem:[#allocation3 + $0x4] sm:$0x3] %vm248_vm6, %v967_v59  ;;  %1434 = vmatmul.msk.f32.vlgmr.msrb.gmra.mxu3 %vm178_vm1, %v967_v59 }
0x1249   :  { %v698_v63 = vpop.permute.xlu2 %697 }
0x124a   :  { %v2095_v2 = vadd.f32 %v698_v63, %v690_v1 }
0x12c5   :  { %v990_v61 = vpop.f32.mrf.mxu3 }
0x12c6   :  { %v993_v62 = vadd.f32 %v990_v61, %v970_v60 }
0x12c8   :  { %1552 = vtanh.f32 %v993_v62  ;;  %v1435_v6 = vmul.f32 -1.442695, %v993_v62 }
0x12c9   :  { %1554 = vtanh.f32 %v2095_v2 }
0x12ca   :  { %1556 = vpow2.f32 %v1435_v6 }
0x12ce   :  { %v1553_v4 = vpop.eup %1552 }
0x12cf   :  { %1016 = vrot.lane.b32.xlu1 %v1553_v4, %s1830_s2  ;;  %v1555_v5 = vpop.eup %1554 }
0x12d0   :  { %v1557_v7 = vpop.eup %1556 }
0x12d1   :  { %v997_v8 = vadd.f32 1.0, %v1557_v7 }
0x12d3   :  { %1558 = vrcp.f32 %v997_v8  ;;  %v1009_v13 = vand.u32 2147483648, %v997_v8  ;;  %vm1003_vm9 = vweird.f32 %v997_v8  ;;  %v1007_v14 = vand.u32 2147483647, %v997_v8 }
0x12d5   :  { %v1010_v16 = vor.u32 1.1754944e-38, %v1009_v13  ;;  %vm1008_vm11 = vcmp.eq.f32.partialorder %v1007_v14, 8.507059e+37 }
0x12d7   :  { %703 = vrot.lane.b32.xlu1 %v1555_v5, %s1830_s2 }
0x12d9   :  { %v1559_v10 = vpop.eup %1558 }
0x12da   :  { %v999_v11 = vmul.f32 %v1559_v10, %v997_v8  ;;  %vm1004_vm8 = vweird.f32 %v1559_v10 }
0x12db   :  { %vm1005_vm10 = vmor %vm1003_vm9, %vm1004_vm8 }
0x12dc   :  { %v1000_v9 = vsub.f32 1.0, %v999_v11 }
0x12de   :  { %v1001_v12 = vmul.f32 %v1559_v10, %v1000_v9 }
0x12e0   :  { %v1002_v3 = vadd.f32 %v1559_v10, %v1001_v12 }
0x12e2   :  { %v1006_v15 = vsel %vm1005_vm10, %v1559_v10, %v1002_v3 }
0x12e3   :  { %v1011_v18 = vsel %vm1008_vm11, %v1010_v16, %v1006_v15 }
0x12e4   :  { %v1014_v20 = vmul.f32 %v1011_v18, %v2086_v40  ;;  %v2124_v40 = vld [vmem:[#allocation13] ss:$0 sm:$0xff] }
0x1341   :  { %v1017_v17 = vpop.permute.xlu1 %1016 }
0x1342   :  { %v1019_v19 = vmul.f32 %v1017_v17, %v1011_v18 }
0x1344   :  { %1021 = vrot.lane.b32.xlu0 %v1019_v19, %s1830_s2 }
0x1349   :  { %v704_v25 = vpop.permute.xlu1 %703 }
0x134a   :  { %v706_v26 = vmul.f32 %v704_v25, %v687_v57 }
0x134c   :  { %708 = vrot.lane.b32.xlu0 %v706_v26, %s1831_s30 }
0x13b6   :  { %v1022_v27 = vpop.permute.xlu0 %1021 }
0x13b7   :  { %v1024_v28 = vadd.f32 %v1022_v27, %v1014_v20 }
0x13b9   :  { %1560 = vtanh.f32 %v1024_v28 }
0x13be   :  { %v709_v21 = vpop.permute.xlu0 %708 }
0x13bf   :  { %v1561_v22 = vpop.eup %1560  ;;  %711 = vst.msk [vmem:[#allocation3 + $0xe] sm:$0x3] %vm248_vm6, %v709_v21 }
0x13c0   :  { %712 = vst.msk [vmem:[#allocation16] sm:$0x3] %vm248_vm6, %v709_v21  ;;  %1027 = vrot.lane.b32.xlu2 %v1561_v22, %s1830_s2 }
0x13c6   :  { %v728_v23 = vld [vmem:[#allocation3 + $0x8] sm:$0xff] }
0x13c7   :  { %1425 = vmatmul.msk.f32.gmra.mxu2 %vm178_vm1, %v728_v23 }
0x141a   :  { %v1028_v24 = vpop.permute.xlu2 %1027 }
0x141b   :  { %v1030_v29 = vmul.f32 %v1028_v24, %v1011_v18 }
0x141d   :  { %1032 = vrot.lane.b32.xlu1 %v1030_v29, %s1831_s30 }
0x144a   :  { %v758_v30 = vpop.f32.mrf.mxu2 }
0x144b   :  { %v759_v31 = vadd.f32 %v1987_v0, %v758_v30 }
0x144d   :  { %762 = vst [vmem:[#allocation2 + $0x8] sm:$0xff] %v759_v31 }
0x1454   :  { %v1036_v37 = vld [vmem:[#allocation2 + $0x8] sm:$0x3]  ;;  %v1102_v5 = vld [vmem:[#allocation2 + $0xa] sm:$0x3]  ;;  %v1168_v30 = vld [vmem:[#allocation2 + $0xc] sm:$0x3] }
0x148f   :  { %v1033_v0 = vpop.permute.xlu1 %1032 }
0x1490   :  { %1035 = vst.msk [vmem:[#allocation3 + $0x6] sm:$0x3] %vm248_vm6, %v1033_v0  ;;  %1436 = vmatmul.msk.f32.vlgmr.msrb.gmra.mxu0 %vm178_vm1, %v1033_v0 }
0x1497   :  { %v1312_v36 = vld [vmem:[#allocation3] sm:$0xff] }
0x1498   :  { %1444 = vmatmul.msk.f32.vlgmr.msra.gmra.mxu0 %vm178_vm1, %v1312_v36 }
0x150d   :  { %v1056_v38 = vpop.f32.mrf.mxu0 }
0x150e   :  { %v1059_v39 = vadd.f32 %v1056_v38, %v1036_v37 }
0x1510   :  { %1562 = vtanh.f32 %v1059_v39  ;;  %v1437_v44 = vmul.f32 -1.442695, %v1059_v39 }
0x1512   :  { %1564 = vpow2.f32 %v1437_v44 }
0x1515   :  { %v1341_v41 = vpop.f32.mrf.mxu0 }
0x1516   :  { %v1563_v42 = vpop.eup %1562  ;;  %v1342_v43 = vadd.f32 %v2124_v40, %v1341_v41 }
0x1517   :  { %1082 = vrot.lane.b32.xlu2 %v1563_v42, %s1830_s2 }
0x1518   :  { %1347 = vst.msk [vmem:[#allocation15] sm:$0xff] %vm143_vm0, %v1342_v43  ;;  %v1565_v45 = vpop.eup %1564 }
0x1519   :  { %v1063_v46 = vadd.f32 1.0, %v1565_v45 }
0x151b   :  { %1566 = vrcp.f32 %v1063_v46  ;;  %v1075_v52 = vand.u32 2147483648, %v1063_v46  ;;  %vm1069_vm13 = vweird.f32 %v1063_v46  ;;  %v1073_v53 = vand.u32 2147483647, %v1063_v46 }
0x151d   :  { %v1076_v55 = vor.u32 1.1754944e-38, %v1075_v52  ;;  %vm1074_vm15 = vcmp.eq.f32.partialorder %v1073_v53, 8.507059e+37 }
0x1521   :  { %v1567_v47 = vpop.eup %1566 }
0x1522   :  { %v1065_v48 = vmul.f32 %v1567_v47, %v1063_v46  ;;  %vm1070_vm12 = vweird.f32 %v1567_v47 }
0x1523   :  { %vm1071_vm14 = vmor %vm1069_vm13, %vm1070_vm12 }
0x1524   :  { %v1066_v49 = vsub.f32 1.0, %v1065_v48 }
0x1526   :  { %v1067_v50 = vmul.f32 %v1567_v47, %v1066_v49 }
0x1528   :  { %v1068_v51 = vadd.f32 %v1567_v47, %v1067_v50 }
0x152a   :  { %v1072_v54 = vsel %vm1071_vm14, %v1567_v47, %v1068_v51 }
0x152b   :  { %v1077_v57 = vsel %vm1074_vm15, %v1076_v55, %v1072_v54 }
0x152c   :  { %v1080_v59 = vmul.f32 %v1077_v57, %v1024_v28 }
0x1571   :  { %v1083_v56 = vpop.permute.xlu2 %1082 }
0x1572   :  { %v1085_v58 = vmul.f32 %v1083_v56, %v1077_v57  ;;  %v1234_v56 = vld [vmem:[#allocation2 + $0xe] sm:$0x3] }
0x1574   :  { %1087 = vrot.lane.b32.xlu0 %v1085_v58, %s1830_s2 }
0x15e6   :  { %v1088_v60 = vpop.permute.xlu0 %1087 }
0x15e7   :  { %v1090_v61 = vadd.f32 %v1088_v60, %v1080_v59 }
0x15e9   :  { %1568 = vtanh.f32 %v1090_v61 }
0x15ef   :  { %v1569_v62 = vpop.eup %1568 }
0x15f0   :  { %1093 = vrot.lane.b32.xlu1 %v1569_v62, %s1830_s2 }
0x1662   :  { %v1094_v63 = vpop.permute.xlu1 %1093 }
0x1663   :  { %v1096_v1 = vmul.f32 %v1094_v63, %v1077_v57 }
0x1665   :  { %1098 = vrot.lane.b32.xlu2 %v1096_v1, %s1831_s30 }
0x16bf   :  { %v1099_v4 = vpop.permute.xlu2 %1098 }
0x16c0   :  { %1101 = vst.msk [vmem:[#allocation3 + $0x8] sm:$0x3] %vm248_vm6, %v1099_v4  ;;  %1438 = vmatmul.msk.f32.vlgmr.msrb.gmra.mxu1 %vm178_vm1, %v1099_v4 }
0x173d   :  { %v1122_v6 = vpop.f32.mrf.mxu1 }
0x173e   :  { %v1125_v7 = vadd.f32 %v1122_v6, %v1102_v5 }
0x1740   :  { %1570 = vtanh.f32 %v1125_v7  ;;  %v1439_v10 = vmul.f32 -1.442695, %v1125_v7 }
0x1742   :  { %1572 = vpow2.f32 %v1439_v10 }
0x1746   :  { %v1571_v8 = vpop.eup %1570 }
0x1747   :  { %1148 = vrot.lane.b32.xlu0 %v1571_v8, %s1830_s2 }
0x1748   :  { %v1573_v11 = vpop.eup %1572 }
0x1749   :  { %v1129_v9 = vadd.f32 1.0, %v1573_v11 }
0x174b   :  { %1574 = vrcp.f32 %v1129_v9  ;;  %v1141_v16 = vand.u32 2147483648, %v1129_v9  ;;  %vm1135_vm3 = vweird.f32 %v1129_v9  ;;  %v1139_v17 = vand.u32 2147483647, %v1129_v9 }
0x174d   :  { %v1142_v19 = vor.u32 1.1754944e-38, %v1141_v16  ;;  %vm1140_vm5 = vcmp.eq.f32.partialorder %v1139_v17, 8.507059e+37 }
0x1751   :  { %v1575_v12 = vpop.eup %1574 }
0x1752   :  { %v1131_v3 = vmul.f32 %v1575_v12, %v1129_v9  ;;  %vm1136_vm2 = vweird.f32 %v1575_v12 }
0x1753   :  { %vm1137_vm4 = vmor %vm1135_vm3, %vm1136_vm2 }
0x1754   :  { %v1132_v13 = vsub.f32 1.0, %v1131_v3 }
0x1756   :  { %v1133_v14 = vmul.f32 %v1575_v12, %v1132_v13 }
0x1758   :  { %v1134_v15 = vadd.f32 %v1575_v12, %v1133_v14 }
0x175a   :  { %v1138_v18 = vsel %vm1137_vm4, %v1575_v12, %v1134_v15 }
0x175b   :  { %v1143_v26 = vsel %vm1140_vm5, %v1142_v19, %v1138_v18 }
0x175c   :  { %v1146_v27 = vmul.f32 %v1143_v26, %v1090_v61 }
0x17b9   :  { %v1149_v25 = vpop.permute.xlu0 %1148 }
0x17ba   :  { %v1151_v20 = vmul.f32 %v1149_v25, %v1143_v26 }
0x17bc   :  { %1153 = vrot.lane.b32.xlu1 %v1151_v20, %s1830_s2 }
0x182e   :  { %v1154_v28 = vpop.permute.xlu1 %1153 }
0x182f   :  { %v1156_v21 = vadd.f32 %v1154_v28, %v1146_v27 }
0x1831   :  { %1576 = vtanh.f32 %v1156_v21 }
0x1837   :  { %v1577_v22 = vpop.eup %1576 }
0x1838   :  { %1159 = vrot.lane.b32.xlu2 %v1577_v22, %s1830_s2 }
0x1892   :  { %v1160_v23 = vpop.permute.xlu2 %1159 }
0x1893   :  { %v1162_v24 = vmul.f32 %v1160_v23, %v1143_v26 }
0x1895   :  { %1164 = vrot.lane.b32.xlu0 %v1162_v24, %s1831_s30 }
0x1907   :  { %v1165_v29 = vpop.permute.xlu0 %1164 }
0x1908   :  { %1167 = vst.msk [vmem:[#allocation3 + $0xa] sm:$0x3] %vm248_vm6, %v1165_v29  ;;  %1440 = vmatmul.msk.f32.vlgmr.msrb.gmra.mxu2 %vm178_vm1, %v1165_v29 }
0x198b   :  { %v1188_v31 = vpop.f32.mrf.mxu2 }
0x198c   :  { %v1191_v32 = vadd.f32 %v1188_v31, %v1168_v30 }
0x198e   :  { %1578 = vtanh.f32 %v1191_v32  ;;  %v1441_v34 = vmul.f32 -1.442695, %v1191_v32 }
0x1990   :  { %1580 = vpow2.f32 %v1441_v34 }
0x1994   :  { %v1579_v33 = vpop.eup %1578 }
0x1995   :  { %1214 = vrot.lane.b32.xlu1 %v1579_v33, %s1830_s2 }
0x1996   :  { %v1581_v35 = vpop.eup %1580 }
0x1997   :  { %v1195_v0 = vadd.f32 1.0, %v1581_v35 }
0x1999   :  { %1582 = vrcp.f32 %v1195_v0  ;;  %v1207_v42 = vand.u32 2147483648, %v1195_v0  ;;  %vm1201_vm8 = vweird.f32 %v1195_v0  ;;  %v1205_v43 = vand.u32 2147483647, %v1195_v0 }
0x199b   :  { %v1208_v45 = vor.u32 1.1754944e-38, %v1207_v42  ;;  %vm1206_vm10 = vcmp.eq.f32.partialorder %v1205_v43, 8.507059e+37 }
0x199f   :  { %v1583_v36 = vpop.eup %1582 }
0x19a0   :  { %v1197_v37 = vmul.f32 %v1583_v36, %v1195_v0  ;;  %vm1202_vm7 = vweird.f32 %v1583_v36 }
0x19a1   :  { %vm1203_vm9 = vmor %vm1201_vm8, %vm1202_vm7 }
0x19a2   :  { %v1198_v38 = vsub.f32 1.0, %v1197_v37 }
0x19a4   :  { %v1199_v39 = vmul.f32 %v1583_v36, %v1198_v38 }
0x19a6   :  { %v1200_v41 = vadd.f32 %v1583_v36, %v1199_v39 }
0x19a8   :  { %v1204_v44 = vsel %vm1203_vm9, %v1583_v36, %v1200_v41 }
0x19a9   :  { %v1209_v47 = vsel %vm1206_vm10, %v1208_v45, %v1204_v44 }
0x19aa   :  { %v1212_v49 = vmul.f32 %v1209_v47, %v1156_v21 }
0x1a07   :  { %v1215_v46 = vpop.permute.xlu1 %1214 }
0x1a08   :  { %v1217_v48 = vmul.f32 %v1215_v46, %v1209_v47 }
0x1a0a   :  { %1219 = vrot.lane.b32.xlu2 %v1217_v48, %s1830_s2 }
0x1a64   :  { %v1220_v50 = vpop.permute.xlu2 %1219 }
0x1a65   :  { %v1222_v51 = vadd.f32 %v1220_v50, %v1212_v49 }
0x1a67   :  { %1584 = vtanh.f32 %v1222_v51 }
0x1a6d   :  { %v1585_v52 = vpop.eup %1584 }
0x1a6e   :  { %1225 = vrot.lane.b32.xlu0 %v1585_v52, %s1830_s2 }
0x1ae0   :  { %v1226_v53 = vpop.permute.xlu0 %1225 }
0x1ae1   :  { %v1228_v54 = vmul.f32 %v1226_v53, %v1209_v47 }
0x1ae3   :  { %1230 = vrot.lane.b32.xlu1 %v1228_v54, %s1831_s30 }
0x1b55   :  { %v1231_v55 = vpop.permute.xlu1 %1230 }
0x1b56   :  { %1233 = vst.msk [vmem:[#allocation3 + $0xc] sm:$0x3] %vm248_vm6, %v1231_v55  ;;  %1442 = vmatmul.msk.f32.vlgmr.msra.gmra.mxu3 %vm178_vm1, %v1231_v55 }
0x1bd9   :  { %v1254_v57 = vpop.f32.mrf.mxu3 }
0x1bda   :  { %v1257_v58 = vadd.f32 %v1254_v57, %v1234_v56 }
0x1bdc   :  { %1586 = vtanh.f32 %v1257_v58  ;;  %v1443_v60 = vmul.f32 -1.442695, %v1257_v58 }
0x1bde   :  { %1588 = vpow2.f32 %v1443_v60 }
0x1be2   :  { %v1587_v59 = vpop.eup %1586 }
0x1be3   :  { %1280 = vrot.lane.b32.xlu2 %v1587_v59, %s1830_s2 }
0x1be4   :  { %v1589_v61 = vpop.eup %1588 }
0x1be5   :  { %v1261_v62 = vadd.f32 1.0, %v1589_v61 }
0x1be7   :  { %1590 = vrcp.f32 %v1261_v62  ;;  %v1273_v7 = vand.u32 2147483648, %v1261_v62  ;;  %vm1267_vm12 = vweird.f32 %v1261_v62  ;;  %v1271_v8 = vand.u32 2147483647, %v1261_v62 }
0x1be9   :  { %v1274_v11 = vor.u32 1.1754944e-38, %v1273_v7  ;;  %vm1272_vm14 = vcmp.eq.f32.partialorder %v1271_v8, 8.507059e+37 }
0x1bed   :  { %v1591_v63 = vpop.eup %1590 }
0x1bee   :  { %v1263_v1 = vmul.f32 %v1591_v63, %v1261_v62  ;;  %vm1268_vm11 = vweird.f32 %v1591_v63 }
0x1bef   :  { %vm1269_vm13 = vmor %vm1267_vm12, %vm1268_vm11 }
0x1bf0   :  { %v1264_v4 = vsub.f32 1.0, %v1263_v1 }
0x1bf2   :  { %v1265_v5 = vmul.f32 %v1591_v63, %v1264_v4 }
0x1bf4   :  { %v1266_v6 = vadd.f32 %v1591_v63, %v1265_v5 }
0x1bf6   :  { %v1270_v10 = vsel %vm1269_vm13, %v1591_v63, %v1266_v6 }
0x1bf7   :  { %v1275_v12 = vsel %vm1272_vm14, %v1274_v11, %v1270_v10 }
0x1bf8   :  { %v1278_v13 = vmul.f32 %v1275_v12, %v1222_v51 }
0x1c3d   :  { %v1281_v9 = vpop.permute.xlu2 %1280 }
0x1c3e   :  { %v1283_v3 = vmul.f32 %v1281_v9, %v1275_v12 }
0x1c40   :  { %1285 = vrot.lane.b32.xlu0 %v1283_v3, %s1830_s2 }
0x1c48   :  { %714 = vrot.lane.b32.xlu0 %v2095_v2, %s1832_s7 }
0x1cb2   :  { %v1286_v14 = vpop.permute.xlu0 %1285 }
0x1cb3   :  { %v1288_v15 = vadd.f32 %v1286_v14, %v1278_v13 }
0x1cb5   :  { %1592 = vtanh.f32 %v1288_v15 }
0x1cba   :  { %v715_v16 = vpop.permute.xlu0 %714 }
0x1cbb   :  { %v1593_v17 = vpop.eup %1592  ;;  %717 = vst.msk [vmem:[#allocation18] sm:$0x3] %vm248_vm6, %v715_v16 }
0x1cbc   :  { %1291 = vrot.lane.b32.xlu1 %v1593_v17, %s1830_s2 }
0x1cc4   :  { %1303 = vrot.lane.b32.xlu1 %v1288_v15, %s1832_s7 }
0x1d2e   :  { %v1292_v18 = vpop.permute.xlu1 %1291 }
0x1d2f   :  { %v1294_v19 = vmul.f32 %v1292_v18, %v1275_v12 }
0x1d31   :  { %1296 = vrot.lane.b32.xlu2 %v1294_v19, %s1831_s30  ;;  %s1353_s30 = sshll.u32 %s1836_s12, 4  ;;  %s1354_s30 = int_to_ptr.vmem [resolvable:$true] %s1353_s30 }
0x1d36   :  { %v1304_v25 = vpop.permute.xlu1 %1303 }
0x1d37   :  { %1307 = vst.msk [vmem:[#allocation18 + $0x2] sm:$0x3] %vm248_vm6, %v1304_v25 }
0x1d8b   :  { %v1297_v26 = vpop.permute.xlu2 %1296 }
0x1d8c   :  { %1299 = vst.msk [vmem:[#allocation3 + $0xe] sm:$0x3] %vm248_vm6, %v1297_v26 }
0x1d8d   :  { %1301 = vst.msk [vmem:[#allocation16 + $0x2] sm:$0x3] %vm248_vm6, %v1297_v26 }
0x1d8e   :  { %1374 = dma.vmem_to_hbm [thread:$0]  %s1367_s24, 64, %s1369_s0, [#allocation17], %s1830_s2, %s1830_s2, %s1834_s1  }
0x1d8f   :  { %1387 = dma.vmem_to_hbm [thread:$0]  %s1380_s4, 64, %s1382_s28, [#allocation17], %s1830_s2, %s1830_s2, %s1834_s1  }
0x1d93   :  { %v1313_v2 = vld [vmem:[#allocation3 + $0x8] sm:$0xff] }
0x1d94   :  { %1445 = vmatmul.msk.f32.gmra.mxu0 %vm178_vm1, %v1313_v2 }
0x1e11   :  { %v1344_v20 = vpop.f32.mrf.mxu0 }
0x1e12   :  { %v1345_v27 = vadd.f32 %v2124_v40, %v1344_v20 }
0x1e14   :  { %1348 = vst.msk [vmem:[#allocation15 + $0x8] sm:$0xff] %vm143_vm0, %v1345_v27 }
0x1e15   :  { %1361 = dma.vmem_to_hbm [thread:$0]  %s1354_s30, 256, %s1356_s9, [#allocation6], %s1824_s3, %s1824_s3, %s1825_s21  }
0x1e16   :  { %1818 = dma.done.wait [#allocation6], 256  }
0x1e17   :  { %1819 = vsyncadd [#allocation6], 4294967040 }
0x1e18   :  { %1820 = dma.done.wait [#allocation17], 128  }
0x1e19   :  { %1821 = vsyncadd [#allocation17], 4294967168 }
0x1e1a   :  { %1400 = vsyncpa [#allocation5], 1 }
0x1e1b   :  { %1401 = vsyncpa [#allocation8], 1 }
0x1e1c   :  { %1402 = vsyncpa [#allocation11], 1 }
0x1e1d   :  { %1403 = vsyncpa [#allocation14], 1 }
0x1e1e   :  { %1404 = vsyncpa [#allocation6], 1 }
0x1e1f   :  { %1405 = vsyncpa [#allocation17], 1 }

</bundles_post_ra>
